<compile_context>
chip_gen: v6e
topology: v6e:2x2x1
jax: 0.10.0
libtpu: 0.0.40
codegen_flags: <defaults>
</compile_context>

<pallas_src>
import jax
import jax.numpy as jnp
from jax.experimental import pallas as pl
from jax.experimental.pallas import tpu as pltpu


def _round_up(n, m):
    return ((n + m - 1) // m) * m


def _pad2d(a, rows, cols):
    r, c = a.shape
    return jnp.pad(a, ((0, rows - r), (0, cols - c)))


def _vmem_capacity_bytes():
    try:
        return int(pltpu.get_tpu_info().vmem_capacity_bytes)
    except Exception:
        return 64 * 1024 * 1024            # conservative: v7x per-TC VMEM


def _is_single_tensorcore():
    """v5e / v6e have a single TensorCore; v7x has two."""
    try:
        kind = jax.devices()[0].device_kind.lower()
        return any(t in kind for t in ("v5e", "v5 lite", "v5lite", "v6"))
    except Exception:
        return False                       # unknown -> assume 2 TCs, split is cheap


# ----------------------------------------------------------------------------
# Kernel body: fused 4-layer MLP on one batch tile, all weights VMEM-resident.
# ----------------------------------------------------------------------------
def _encoder_kernel(x_ref,
                    w1_ref, b1_ref,          # fc1:     in_dim -> hidden
                    wa_ref, ba_ref,          # enc L1:  hidden -> hidden
                    wb_ref, bb_ref,          # enc L2:  hidden -> hidden
                    wo_ref, bo_ref,          # enc out: hidden -> embed
                    out_ref):
    mm_dtype = w1_ref.dtype                  # f32 or bf16 matmul operands
    x = x_ref[...]

    # fc1 + ReLU (reference applies ReLU twice; it is idempotent -> once here)
    h = jnp.dot(x, w1_ref[...], preferred_element_type=jnp.float32) + b1_ref[...]
    h = jnp.maximum(h, 0.0)

    # encoder hidden layer 1 + ReLU
    h = jnp.dot(h.astype(mm_dtype), wa_ref[...],
                preferred_element_type=jnp.float32) + ba_ref[...]
    h = jnp.maximum(h, 0.0)

    # encoder hidden layer 2 + ReLU
    h = jnp.dot(h.astype(mm_dtype), wb_ref[...],
                preferred_element_type=jnp.float32) + bb_ref[...]
    h = jnp.maximum(h, 0.0)

    # encoder output projection (no activation)
    out = jnp.dot(h.astype(mm_dtype), wo_ref[...],
                  preferred_element_type=jnp.float32) + bo_ref[...]
    out_ref[...] = out.astype(out_ref.dtype)


# ----------------------------------------------------------------------------
# One-time parameter preparation (hoisted out of the forward path).
# ----------------------------------------------------------------------------
def prepare_params(params, compute_dtype=jnp.bfloat16):
    """Pad + cast weights once. Padded hidden/embed columns carry zero bias and
    zero outgoing weights, so padding is exactly neutral."""
    in_dim, hidden = params["w1"].shape
    embed = params["wo"].shape[1]

    # hidden/embed lane-padded to 128; in_dim left unpadded when < 128
    # (block == full array dim satisfies the (8,128) exception).
    in_p = in_dim if in_dim < 128 else _round_up(in_dim, 128)
    hid_p = _round_up(hidden, 128)
    emb_p = _round_up(embed, 128)

    mm = compute_dtype
    prepped = dict(
        w1=_pad2d(params["w1"], in_p, hid_p).astype(mm),
        wa=_pad2d(params["wa"], hid_p, hid_p).astype(mm),
        wb=_pad2d(params["wb"], hid_p, hid_p).astype(mm),
        wo=_pad2d(params["wo"], hid_p, emb_p).astype(mm),
        b1=_pad2d(params["b1"], 1, hid_p).astype(jnp.float32),   # biases stay f32
        ba=_pad2d(params["ba"], 1, hid_p).astype(jnp.float32),
        bb=_pad2d(params["bb"], 1, hid_p).astype(jnp.float32),
        bo=_pad2d(params["bo"], 1, emb_p).astype(jnp.float32),
    )
    meta = dict(in_dim=in_dim, hidden=hidden, embed=embed,
                in_p=in_p, hid_p=hid_p, emb_p=emb_p, compute_dtype=mm)
    return prepped, meta


def _choose_tile_b(B, in_p, hid_p, emb_p, mm_bytes, act_budget, want_split):
    """Batch tile: multiple of 8, VMEM-safe; split >=2 only on multi-TC chips."""
    b8 = _round_up(max(B, 1), 8)
    tile = _round_up(-(-b8 // 2), 8) if (want_split and b8 >= 16) else b8
    tile = min(tile, 1024)
    while True:
        act_bytes = (2 * tile * in_p * mm_bytes      # double-buffered x tile
                     + 2 * tile * emb_p * 4          # double-buffered out tile
                     + 3 * tile * hid_p * 4)         # live f32 intermediates
        if act_bytes <= act_budget or tile <= 8:
            break
        tile = max(8, _round_up(tile // 2, 8))
    return tile


def _build_encoder_call(tile_b, in_p, hid_p, emb_p, Bp, mm_bytes,
                        out_dtype, vmem_limit, single_buffer_weights):
    grid = (Bp // tile_b,)

    def wspec(shape):
        # Grid-invariant residents: index_map is constant, so a second buffer
        # is pure VMEM waste -> single-buffer them.
        if single_buffer_weights:
            return pl.BlockSpec(shape, lambda i: (0, 0),
                                pipeline_mode=pl.Buffered(1))
        return pl.BlockSpec(shape, lambda i: (0, 0))

    flops = 2 * Bp * (in_p * hid_p + 2 * hid_p * hid_p + hid_p * emb_p)
    bytes_accessed = (Bp * in_p * mm_bytes
                      + (in_p * hid_p + 2 * hid_p * hid_p + hid_p * emb_p) * mm_bytes
                      + (3 * hid_p + emb_p) * 4
                      + Bp * emb_p * jnp.dtype(out_dtype).itemsize)

    return pl.pallas_call(
        _encoder_kernel,
        out_shape=jax.ShapeDtypeStruct((Bp, emb_p), out_dtype),
        grid=grid,
        in_specs=[
            pl.BlockSpec((tile_b, in_p), lambda i: (i, 0)),      # streamed x tile
            wspec((in_p, hid_p)), wspec((1, hid_p)),
            wspec((hid_p, hid_p)), wspec((1, hid_p)),
            wspec((hid_p, hid_p)), wspec((1, hid_p)),
            wspec((hid_p, emb_p)), wspec((1, emb_p)),
        ],
        out_specs=pl.BlockSpec((tile_b, emb_p), lambda i: (i, 0)),
        compiler_params=pltpu.CompilerParams(
            dimension_semantics=("parallel",),
            vmem_limit_bytes=vmem_limit),
        cost_estimate=pl.CostEstimate(flops=flops, transcendentals=0,
                                      bytes_accessed=bytes_accessed),
    )


def encoder_forward(x, prepped, meta, *, tile_b=None, out_dtype=jnp.float32):
    """Fused Encoder MLP. x: [B, in_dim]. Returns [B, embed] in out_dtype."""
    B, in_dim = x.shape
    assert in_dim == meta["in_dim"]
    in_p, hid_p, emb_p = meta["in_p"], meta["hid_p"], meta["emb_p"]
    mm = meta["compute_dtype"]
    mm_bytes = jnp.dtype(mm).itemsize

    cap = _vmem_capacity_bytes()
    budget = int(cap * 0.6)                 # tiling budget
    vmem_limit = int(cap * 0.75)            # explicit scoped-VMEM limit

    # Resident (single-buffered) weight + bias footprint.
    weight_bytes = ((in_p * hid_p + 2 * hid_p * hid_p + hid_p * emb_p) * mm_bytes
                    + (3 * hid_p + emb_p) * 4)
    # TODO(synk): when weight_bytes exceeds the budget (~40 MiB on v7x,
    # ~77 MiB on v5e/v6e) split the hidden x hidden weights over a trailing
    # "arbitrary" K grid axis with a VMEM f32 accumulator instead of full
    # residency.
    if weight_bytes > budget:
        raise NotImplementedError(
            "Resident-weight footprint exceeds VMEM budget; K-split path not "
            "implemented for this configuration.")

    if tile_b is None:
        tile_b = _choose_tile_b(B, in_p, hid_p, emb_p, mm_bytes,
                                act_budget=budget - weight_bytes,
                                want_split=not _is_single_tensorcore())
    assert tile_b % 8 == 0

    Bp = _round_up(B, tile_b)
    xp = _pad2d(x, Bp, in_p).astype(mm)     # per-call: only x is padded/cast

    args = (xp, prepped["w1"], prepped["b1"], prepped["wa"], prepped["ba"],
            prepped["wb"], prepped["bb"], prepped["wo"], prepped["bo"])

    try:
        out = _build_encoder_call(tile_b, in_p, hid_p, emb_p, Bp, mm_bytes,
                                  out_dtype, vmem_limit,
                                  single_buffer_weights=True)(*args)
    except Exception:
        # Fallback if this Pallas build rejects Buffered(1) on untiled blocks.
        out = _build_encoder_call(tile_b, in_p, hid_p, emb_p, Bp, mm_bytes,
                                  out_dtype, vmem_limit,
                                  single_buffer_weights=False)(*args)

    return out[:B, :meta["embed"]]


# ----------------------------------------------------------------------------
# Reference + synthetic params
# ----------------------------------------------------------------------------
def init_params(key, in_dim, hidden, embed):
    """Deterministic synthetic parameters (PyTorch Linear init, pre-transposed)."""
    ks = jax.random.split(key, 8)

    def lin(kw, kb, fan_in, fan_out):
        bound = 1.0 / jnp.sqrt(fan_in)
        w = jax.random.uniform(kw, (fan_in, fan_out), jnp.float32, -bound, bound)
        b = jax.random.uniform(kb, (1, fan_out), jnp.float32, -bound, bound)
        return w, b

    w1, b1 = lin(ks[0], ks[1], in_dim, hidden)
    wa, ba = lin(ks[2], ks[3], hidden, hidden)
    wb, bb = lin(ks[4], ks[5], hidden, hidden)
    wo, bo = lin(ks[6], ks[7], hidden, embed)
    return dict(w1=w1, b1=b1, wa=wa, ba=ba, wb=wb, bb=bb, wo=wo, bo=bo)


def encoder_reference(x, p):
    relu = lambda v: jnp.maximum(v, 0.0)
    h = relu(relu(x @ p["w1"] + p["b1"]))
    h = relu(h @ p["wa"] + p["ba"])
    h = relu(h @ p["wb"] + p["bb"])
    return h @ p["wo"] + p["bo"]


if __name__ == "__main__":
    key = jax.random.PRNGKey(0)
    k_x, k_p = jax.random.split(key)

    batch, in_dim, hidden, embed = 16, 24, 32, 16   # small shapes, layers=2
    x = jax.random.normal(k_x, (batch, in_dim), jnp.float32)
    params = init_params(k_p, in_dim, hidden, embed)
    ref = encoder_reference(x, params)

    # f32 matmul-operand path — tight tolerance vs. the pure-JAX reference
    prepped_f32, meta_f32 = prepare_params(params, compute_dtype=jnp.float32)
    out = jax.block_until_ready(encoder_forward(x, prepped_f32, meta_f32))
    assert out.shape == (batch, embed)
    assert jnp.allclose(out, ref, atol=1e-5, rtol=1e-5)

    # default bf16 matmul operands (v6e/v7x MXU peak); f32 accumulation,
    # f32 bias/ReLU, looser tolerance.
    prepped_bf16, meta_bf16 = prepare_params(params)        # bf16 by default
    out_bf16 = jax.block_until_ready(encoder_forward(x, prepped_bf16, meta_bf16))
    assert out_bf16.shape == (batch, embed)
    assert jnp.allclose(out_bf16, ref, atol=1e-1, rtol=1e-1)

    print("KERNEL_OK")
</pallas_src>

<mosaic_0001>
module attributes {stable_mosaic.version = 11 : i64} {
  func.func @_encoder_kernel(%arg0: i32, %arg1: memref<8x24xf32, #tpu.memory_space<vmem>>, %arg2: memref<24x128xf32, #tpu.memory_space<vmem>>, %arg3: memref<1x128xf32, #tpu.memory_space<vmem>>, %arg4: memref<128x128xf32, #tpu.memory_space<vmem>>, %arg5: memref<1x128xf32, #tpu.memory_space<vmem>>, %arg6: memref<128x128xf32, #tpu.memory_space<vmem>>, %arg7: memref<1x128xf32, #tpu.memory_space<vmem>>, %arg8: memref<128x128xf32, #tpu.memory_space<vmem>>, %arg9: memref<1x128xf32, #tpu.memory_space<vmem>>, %arg10: memref<8x128xf32, #tpu.memory_space<vmem>>) attributes {dimension_semantics = [#tpu.dimension_semantics<parallel>], iteration_bounds = array<i64: 2>, scalar_prefetch = 0 : i64, scratch_operands = 0 : i64, tpu.core_type = #tpu.core_type<tc>, window_params = [{transform_indices = @transform_0, window_bounds = array<i64: 8, 24>}, {pipeline_mode = #tpu.pipeline_mode<synchronous>, transform_indices = @transform_1, window_bounds = array<i64: 24, 128>}, {pipeline_mode = #tpu.pipeline_mode<synchronous>, transform_indices = @transform_2, window_bounds = array<i64: 1, 128>}, {pipeline_mode = #tpu.pipeline_mode<synchronous>, transform_indices = @transform_3, window_bounds = array<i64: 128, 128>}, {pipeline_mode = #tpu.pipeline_mode<synchronous>, transform_indices = @transform_4, window_bounds = array<i64: 1, 128>}, {pipeline_mode = #tpu.pipeline_mode<synchronous>, transform_indices = @transform_5, window_bounds = array<i64: 128, 128>}, {pipeline_mode = #tpu.pipeline_mode<synchronous>, transform_indices = @transform_6, window_bounds = array<i64: 1, 128>}, {pipeline_mode = #tpu.pipeline_mode<synchronous>, transform_indices = @transform_7, window_bounds = array<i64: 128, 128>}, {pipeline_mode = #tpu.pipeline_mode<synchronous>, transform_indices = @transform_8, window_bounds = array<i64: 1, 128>}, {transform_indices = @transform_9, window_bounds = array<i64: 8, 128>}]} {
    %c0 = arith.constant 0 : index
    %c0_0 = arith.constant 0 : index
    %0 = vector.load %arg1[%c0, %c0_0] : memref<8x24xf32, #tpu.memory_space<vmem>>, vector<8x24xf32>
    %c0_1 = arith.constant 0 : index
    %c0_2 = arith.constant 0 : index
    %1 = vector.load %arg2[%c0_1, %c0_2] : memref<24x128xf32, #tpu.memory_space<vmem>>, vector<24x128xf32>
    %cst = arith.constant dense<0.000000e+00> : vector<8x128xf32>
    %2 = tpu.matmul %0, %1, %cst {dimension_numbers = #tpu.dot_dimension_numbers<[1], [0], [0], [1], [0, 0, 1, 1], [], []>} : vector<8x24xf32>, vector<24x128xf32>, vector<8x128xf32> -> vector<8x128xf32>
    %c0_3 = arith.constant 0 : index
    %c0_4 = arith.constant 0 : index
    %3 = vector.load %arg3[%c0_3, %c0_4] : memref<1x128xf32, #tpu.memory_space<vmem>>, vector<1x128xf32>
    %4 = vector.broadcast %3 : vector<1x128xf32> to vector<8x128xf32>
    %5 = arith.addf %2, %4 : vector<8x128xf32>
    %cst_5 = arith.constant 0.000000e+00 : f32
    %6 = vector.broadcast %cst_5 : f32 to vector<8x128xf32>
    %7 = arith.maximumf %5, %6 : vector<8x128xf32>
    %c0_6 = arith.constant 0 : index
    %c0_7 = arith.constant 0 : index
    %8 = vector.load %arg4[%c0_6, %c0_7] : memref<128x128xf32, #tpu.memory_space<vmem>>, vector<128x128xf32>
    %cst_8 = arith.constant dense<0.000000e+00> : vector<8x128xf32>
    %9 = tpu.matmul %7, %8, %cst_8 {dimension_numbers = #tpu.dot_dimension_numbers<[1], [0], [0], [1], [0, 0, 1, 1], [], []>} : vector<8x128xf32>, vector<128x128xf32>, vector<8x128xf32> -> vector<8x128xf32>
    %c0_9 = arith.constant 0 : index
    %c0_10 = arith.constant 0 : index
    %10 = vector.load %arg5[%c0_9, %c0_10] : memref<1x128xf32, #tpu.memory_space<vmem>>, vector<1x128xf32>
    %11 = vector.broadcast %10 : vector<1x128xf32> to vector<8x128xf32>
    %12 = arith.addf %9, %11 : vector<8x128xf32>
    %cst_11 = arith.constant 0.000000e+00 : f32
    %13 = vector.broadcast %cst_11 : f32 to vector<8x128xf32>
    %14 = arith.maximumf %12, %13 : vector<8x128xf32>
    %c0_12 = arith.constant 0 : index
    %c0_13 = arith.constant 0 : index
    %15 = vector.load %arg6[%c0_12, %c0_13] : memref<128x128xf32, #tpu.memory_space<vmem>>, vector<128x128xf32>
    %cst_14 = arith.constant dense<0.000000e+00> : vector<8x128xf32>
    %16 = tpu.matmul %14, %15, %cst_14 {dimension_numbers = #tpu.dot_dimension_numbers<[1], [0], [0], [1], [0, 0, 1, 1], [], []>} : vector<8x128xf32>, vector<128x128xf32>, vector<8x128xf32> -> vector<8x128xf32>
    %c0_15 = arith.constant 0 : index
    %c0_16 = arith.constant 0 : index
    %17 = vector.load %arg7[%c0_15, %c0_16] : memref<1x128xf32, #tpu.memory_space<vmem>>, vector<1x128xf32>
    %18 = vector.broadcast %17 : vector<1x128xf32> to vector<8x128xf32>
    %19 = arith.addf %16, %18 : vector<8x128xf32>
    %cst_17 = arith.constant 0.000000e+00 : f32
    %20 = vector.broadcast %cst_17 : f32 to vector<8x128xf32>
    %21 = arith.maximumf %19, %20 : vector<8x128xf32>
    %c0_18 = arith.constant 0 : index
    %c0_19 = arith.constant 0 : index
    %22 = vector.load %arg8[%c0_18, %c0_19] : memref<128x128xf32, #tpu.memory_space<vmem>>, vector<128x128xf32>
    %cst_20 = arith.constant dense<0.000000e+00> : vector<8x128xf32>
    %23 = tpu.matmul %21, %22, %cst_20 {dimension_numbers = #tpu.dot_dimension_numbers<[1], [0], [0], [1], [0, 0, 1, 1], [], []>} : vector<8x128xf32>, vector<128x128xf32>, vector<8x128xf32> -> vector<8x128xf32>
    %c0_21 = arith.constant 0 : index
    %c0_22 = arith.constant 0 : index
    %24 = vector.load %arg9[%c0_21, %c0_22] : memref<1x128xf32, #tpu.memory_space<vmem>>, vector<1x128xf32>
    %25 = vector.broadcast %24 : vector<1x128xf32> to vector<8x128xf32>
    %26 = arith.addf %23, %25 : vector<8x128xf32>
    %c0_23 = arith.constant 0 : index
    %c0_24 = arith.constant 0 : index
    %27 = vector.load %arg10[%c0_23, %c0_24] : memref<8x128xf32, #tpu.memory_space<vmem>>, vector<8x128xf32>
    tpu.vector_store %arg10[%c0_23, %c0_24], %26 {strides = array<i32>} : memref<8x128xf32, #tpu.memory_space<vmem>>, vector<8x128xf32>,
    return
  }
  func.func @transform_0(%arg0: i32) -> (i32, i32) {
    %c0_i32 = arith.constant 0 : i32
    %c0_i32_0 = arith.constant 0 : i32
    return %arg0, %c0_i32 : i32, i32
  }
  func.func @transform_1(%arg0: i32) -> (i32, i32) {
    %c0_i32 = arith.constant 0 : i32
    %c0_i32_0 = arith.constant 0 : i32
    %c0_i32_1 = arith.constant 0 : i32
    return %c0_i32, %c0_i32_0 : i32, i32
  }
  func.func @transform_2(%arg0: i32) -> (i32, i32) {
    %c0_i32 = arith.constant 0 : i32
    %c0_i32_0 = arith.constant 0 : i32
    %c0_i32_1 = arith.constant 0 : i32
    return %c0_i32, %c0_i32_0 : i32, i32
  }
  func.func @transform_3(%arg0: i32) -> (i32, i32) {
    %c0_i32 = arith.constant 0 : i32
    %c0_i32_0 = arith.constant 0 : i32
    %c0_i32_1 = arith.constant 0 : i32
    return %c0_i32, %c0_i32_0 : i32, i32
  }
  func.func @transform_4(%arg0: i32) -> (i32, i32) {
    %c0_i32 = arith.constant 0 : i32
    %c0_i32_0 = arith.constant 0 : i32
    %c0_i32_1 = arith.constant 0 : i32
    return %c0_i32, %c0_i32_0 : i32, i32
  }
  func.func @transform_5(%arg0: i32) -> (i32, i32) {
    %c0_i32 = arith.constant 0 : i32
    %c0_i32_0 = arith.constant 0 : i32
    %c0_i32_1 = arith.constant 0 : i32
    return %c0_i32, %c0_i32_0 : i32, i32
  }
  func.func @transform_6(%arg0: i32) -> (i32, i32) {
    %c0_i32 = arith.constant 0 : i32
    %c0_i32_0 = arith.constant 0 : i32
    %c0_i32_1 = arith.constant 0 : i32
    return %c0_i32, %c0_i32_0 : i32, i32
  }
  func.func @transform_7(%arg0: i32) -> (i32, i32) {
    %c0_i32 = arith.constant 0 : i32
    %c0_i32_0 = arith.constant 0 : i32
    %c0_i32_1 = arith.constant 0 : i32
    return %c0_i32, %c0_i32_0 : i32, i32
  }
  func.func @transform_8(%arg0: i32) -> (i32, i32) {
    %c0_i32 = arith.constant 0 : i32
    %c0_i32_0 = arith.constant 0 : i32
    %c0_i32_1 = arith.constant 0 : i32
    return %c0_i32, %c0_i32_0 : i32, i32
  }
  func.func @transform_9(%arg0: i32) -> (i32, i32) {
    %c0_i32 = arith.constant 0 : i32
    %c0_i32_0 = arith.constant 0 : i32
    return %arg0, %c0_i32 : i32, i32
  }
}

module attributes {stable_mosaic.version = 11 : i64} {
  func.func @_encoder_kernel(%arg0: i32, %arg1: memref<8x24xf32, #tpu.memory_space<vmem>>, %arg2: memref<24x128xf32, #tpu.memory_space<vmem>>, %arg3: memref<1x128xf32, #tpu.memory_space<vmem>>, %arg4: memref<128x128xf32, #tpu.memory_space<vmem>>, %arg5: memref<1x128xf32, #tpu.memory_space<vmem>>, %arg6: memref<128x128xf32, #tpu.memory_space<vmem>>, %arg7: memref<1x128xf32, #tpu.memory_space<vmem>>, %arg8: memref<128x128xf32, #tpu.memory_space<vmem>>, %arg9: memref<1x128xf32, #tpu.memory_space<vmem>>, %arg10: memref<8x128xf32, #tpu.memory_space<vmem>>) attributes {dimension_semantics = [#tpu.dimension_semantics<parallel>], iteration_bounds = array<i64: 2>, scalar_prefetch = 0 : i64, scratch_operands = 0 : i64, tpu.core_type = #tpu.core_type<tc>, window_params = [{transform_indices = @transform_0, window_bounds = array<i64: 8, 24>}, {pipeline_mode = #tpu.pipeline_mode<synchronous>, transform_indices = @transform_1, window_bounds = array<i64: 24, 128>}, {pipeline_mode = #tpu.pipeline_mode<synchronous>, transform_indices = @transform_2, window_bounds = array<i64: 1, 128>}, {pipeline_mode = #tpu.pipeline_mode<synchronous>, transform_indices = @transform_3, window_bounds = array<i64: 128, 128>}, {pipeline_mode = #tpu.pipeline_mode<synchronous>, transform_indices = @transform_4, window_bounds = array<i64: 1, 128>}, {pipeline_mode = #tpu.pipeline_mode<synchronous>, transform_indices = @transform_5, window_bounds = array<i64: 128, 128>}, {pipeline_mode = #tpu.pipeline_mode<synchronous>, transform_indices = @transform_6, window_bounds = array<i64: 1, 128>}, {pipeline_mode = #tpu.pipeline_mode<synchronous>, transform_indices = @transform_7, window_bounds = array<i64: 128, 128>}, {pipeline_mode = #tpu.pipeline_mode<synchronous>, transform_indices = @transform_8, window_bounds = array<i64: 1, 128>}, {transform_indices = @transform_9, window_bounds = array<i64: 8, 128>}]} {
    %c0 = arith.constant 0 : index
    %c0_0 = arith.constant 0 : index
    %0 = vector.load %arg1[%c0, %c0_0] : memref<8x24xf32, #tpu.memory_space<vmem>>, vector<8x24xf32>
    %c0_1 = arith.constant 0 : index
    %c0_2 = arith.constant 0 : index
    %1 = vector.load %arg2[%c0_1, %c0_2] : memref<24x128xf32, #tpu.memory_space<vmem>>, vector<24x128xf32>
    %cst = arith.constant dense<0.000000e+00> : vector<8x128xf32>
    %2 = tpu.matmul %0, %1, %cst {dimension_numbers = #tpu.dot_dimension_numbers<[1], [0], [0], [1], [0, 0, 1, 1], [], []>} : vector<8x24xf32>, vector<24x128xf32>, vector<8x128xf32> -> vector<8x128xf32>
    %c0_3 = arith.constant 0 : index
    %c0_4 = arith.constant 0 : index
    %3 = vector.load %arg3[%c0_3, %c0_4] : memref<1x128xf32, #tpu.memory_space<vmem>>, vector<1x128xf32>
    %4 = vector.broadcast %3 : vector<1x128xf32> to vector<8x128xf32>
    %5 = arith.addf %2, %4 : vector<8x128xf32>
    %cst_5 = arith.constant 0.000000e+00 : f32
    %6 = vector.broadcast %cst_5 : f32 to vector<8x128xf32>
    %7 = arith.maximumf %5, %6 : vector<8x128xf32>
    %c0_6 = arith.constant 0 : index
    %c0_7 = arith.constant 0 : index
    %8 = vector.load %arg4[%c0_6, %c0_7] : memref<128x128xf32, #tpu.memory_space<vmem>>, vector<128x128xf32>
    %cst_8 = arith.constant dense<0.000000e+00> : vector<8x128xf32>
    %9 = tpu.matmul %7, %8, %cst_8 {dimension_numbers = #tpu.dot_dimension_numbers<[1], [0], [0], [1], [0, 0, 1, 1], [], []>} : vector<8x128xf32>, vector<128x128xf32>, vector<8x128xf32> -> vector<8x128xf32>
    %c0_9 = arith.constant 0 : index
    %c0_10 = arith.constant 0 : index
    %10 = vector.load %arg5[%c0_9, %c0_10] : memref<1x128xf32, #tpu.memory_space<vmem>>, vector<1x128xf32>
    %11 = vector.broadcast %10 : vector<1x128xf32> to vector<8x128xf32>
    %12 = arith.addf %9, %11 : vector<8x128xf32>
    %cst_11 = arith.constant 0.000000e+00 : f32
    %13 = vector.broadcast %cst_11 : f32 to vector<8x128xf32>
    %14 = arith.maximumf %12, %13 : vector<8x128xf32>
    %c0_12 = arith.constant 0 : index
    %c0_13 = arith.constant 0 : index
    %15 = vector.load %arg6[%c0_12, %c0_13] : memref<128x128xf32, #tpu.memory_space<vmem>>, vector<128x128xf32>
    %cst_14 = arith.constant dense<0.000000e+00> : vector<8x128xf32>
    %16 = tpu.matmul %14, %15, %cst_14 {dimension_numbers = #tpu.dot_dimension_numbers<[1], [0], [0], [1], [0, 0, 1, 1], [], []>} : vector<8x128xf32>, vector<128x128xf32>, vector<8x128xf32> -> vector<8x128xf32>
    %c0_15 = arith.constant 0 : index
    %c0_16 = arith.constant 0 : index
    %17 = vector.load %arg7[%c0_15, %c0_16] : memref<1x128xf32, #tpu.memory_space<vmem>>, vector<1x128xf32>
    %18 = vector.broadcast %17 : vector<1x128xf32> to vector<8x128xf32>
    %19 = arith.addf %16, %18 : vector<8x128xf32>
    %cst_17 = arith.constant 0.000000e+00 : f32
    %20 = vector.broadcast %cst_17 : f32 to vector<8x128xf32>
    %21 = arith.maximumf %19, %20 : vector<8x128xf32>
    %c0_18 = arith.constant 0 : index
    %c0_19 = arith.constant 0 : index
    %22 = vector.load %arg8[%c0_18, %c0_19] : memref<128x128xf32, #tpu.memory_space<vmem>>, vector<128x128xf32>
    %cst_20 = arith.constant dense<0.000000e+00> : vector<8x128xf32>
    %23 = tpu.matmul %21, %22, %cst_20 {dimension_numbers = #tpu.dot_dimension_numbers<[1], [0], [0], [1], [0, 0, 1, 1], [], []>} : vector<8x128xf32>, vector<128x128xf32>, vector<8x128xf32> -> vector<8x128xf32>
    %c0_21 = arith.constant 0 : index
    %c0_22 = arith.constant 0 : index
    %24 = vector.load %arg9[%c0_21, %c0_22] : memref<1x128xf32, #tpu.memory_space<vmem>>, vector<1x128xf32>
    %25 = vector.broadcast %24 : vector<1x128xf32> to vector<8x128xf32>
    %26 = arith.addf %23, %25 : vector<8x128xf32>
    %c0_23 = arith.constant 0 : index
    %c0_24 = arith.constant 0 : index
    %27 = vector.load %arg10[%c0_23, %c0_24] : memref<8x128xf32, #tpu.memory_space<vmem>>, vector<8x128xf32>
    tpu.vector_store %arg10[%c0_23, %c0_24], %26 {strides = array<i32>} : memref<8x128xf32, #tpu.memory_space<vmem>>, vector<8x128xf32>,
    return
  }
  func.func @transform_0(%arg0: i32) -> (i32, i32) {
    %c0_i32 = arith.constant 0 : i32
    %c0_i32_0 = arith.constant 0 : i32
    return %arg0, %c0_i32 : i32, i32
  }
  func.func @transform_1(%arg0: i32) -> (i32, i32) {
    %c0_i32 = arith.constant 0 : i32
    %c0_i32_0 = arith.constant 0 : i32
    %c0_i32_1 = arith.constant 0 : i32
    return %c0_i32, %c0_i32_0 : i32, i32
  }
  func.func @transform_2(%arg0: i32) -> (i32, i32) {
    %c0_i32 = arith.constant 0 : i32
    %c0_i32_0 = arith.constant 0 : i32
    %c0_i32_1 = arith.constant 0 : i32
    return %c0_i32, %c0_i32_0 : i32, i32
  }
  func.func @transform_3(%arg0: i32) -> (i32, i32) {
    %c0_i32 = arith.constant 0 : i32
    %c0_i32_0 = arith.constant 0 : i32
    %c0_i32_1 = arith.constant 0 : i32
    return %c0_i32, %c0_i32_0 : i32, i32
  }
  func.func @transform_4(%arg0: i32) -> (i32, i32) {
    %c0_i32 = arith.constant 0 : i32
    %c0_i32_0 = arith.constant 0 : i32
    %c0_i32_1 = arith.constant 0 : i32
    return %c0_i32, %c0_i32_0 : i32, i32
  }
  func.func @transform_5(%arg0: i32) -> (i32, i32) {
    %c0_i32 = arith.constant 0 : i32
    %c0_i32_0 = arith.constant 0 : i32
    %c0_i32_1 = arith.constant 0 : i32
    return %c0_i32, %c0_i32_0 : i32, i32
  }
  func.func @transform_6(%arg0: i32) -> (i32, i32) {
    %c0_i32 = arith.constant 0 : i32
    %c0_i32_0 = arith.constant 0 : i32
    %c0_i32_1 = arith.constant 0 : i32
    return %c0_i32, %c0_i32_0 : i32, i32
  }
  func.func @transform_7(%arg0: i32) -> (i32, i32) {
    %c0_i32 = arith.constant 0 : i32
    %c0_i32_0 = arith.constant 0 : i32
    %c0_i32_1 = arith.constant 0 : i32
    return %c0_i32, %c0_i32_0 : i32, i32
  }
  func.func @transform_8(%arg0: i32) -> (i32, i32) {
    %c0_i32 = arith.constant 0 : i32
    %c0_i32_0 = arith.constant 0 : i32
    %c0_i32_1 = arith.constant 0 : i32
    return %c0_i32, %c0_i32_0 : i32, i32
  }
  func.func @transform_9(%arg0: i32) -> (i32, i32) {
    %c0_i32 = arith.constant 0 : i32
    %c0_i32_0 = arith.constant 0 : i32
    return %arg0, %c0_i32 : i32, i32
  }
}

</mosaic_0001>

<bundles_post_ra>
// kernel: tpu_custom_call.1
= control target key start
LH: loop header
LB: loop body
LE: loop exit
PB: predicated region body
PF: predicated region fallthrough
CT: control target
= control target key end

     0   :  { %s1743_s0 = inlined_call_operand.hbm [shape: f32[16,24], index: 0, kind: input, shape index: {}]   ;;  %s1744_s1 = inlined_call_operand.hbm [shape: f32[24,128], index: 1, kind: input, shape index: {}]   ;;  %s1745_s2 = inlined_call_operand.vmem [shape: f32[1,128], index: 2, kind: input, shape index: {}]   ;;  %s1746_s3 = inlined_call_operand.hbm [shape: f32[128,128], index: 3, kind: input, shape index: {}]   ;;  %s1747_s4 = inlined_call_operand.vmem [shape: f32[1,128], index: 4, kind: input, shape index: {}]   ;;  %s1748_s5 = inlined_call_operand.hbm [shape: f32[128,128], index: 5, kind: input, shape index: {}]   ;;  %s1749_s6 = inlined_call_operand.vmem [shape: f32[1,128], index: 6, kind: input, shape index: {}]   ;;  %s1750_s7 = inlined_call_operand.hbm [shape: f32[128,128], index: 7, kind: input, shape index: {}]   ;;  %s1751_s8 = inlined_call_operand.vmem [shape: f32[1,128], index: 8, kind: input, shape index: {}]   ;;  %s1752_s9 = inlined_call_operand.hbm [shape: f32[16,128], index: 9, kind: output, shape index: {}]  }
   0x1   :  { %1757 = sst [smem:[#allocation16_spill]] %s1744_s1 }
   0x2   :  { %1758 = sst [smem:[#allocation17_spill]] %s1746_s3 }
   0x3   :  { %1759 = sst [smem:[#allocation18_spill]] %s1748_s5 }
   0x4   :  { %1760 = sst [smem:[#allocation19_spill]] %s1750_s7 }
   0x5   :  { %14 = vsyncpa [#allocation3], 0 }
   0x6   :  { %16 = vsyncpa [#allocation3 + $0x1], 0 }
   0x7   :  { %17 = vsyncpa [#allocation6], 0 }
   0x8   :  { %18 = vsyncpa [#allocation9], 0 }
   0x9   :  { %19 = vsyncpa [#allocation4], 0 }
   0xa   :  { %21 = vsyncpa [#allocation4 + $0x1], 0  ;;  %s1447_s30 = smov 0   ;;  %s1449_s10 = smov 0  }
   0xb   :  { %s1451_s11 = smov 0   ;;  %s1453_s12 = smov 0  }
   0xc LB: > { %s1387_s13 = smov [#allocation5]   ;;  %s1468_s15 = sadd.s32 4294967295, %s1385_s12   ;;  %s1385_s12 = sphi %s1453_s12, %s1784_s12   ;;  %s1381_s11 = sphi %s1451_s11, %s1783_s11   ;;  %s1377_s10 = sphi %s1449_s10, %s1782_s10   ;;  %s1373_s30 = sphi %s1447_s30, %s1781_s30  }
   0xd   : > { %s264_s14 = sshll.u32 %s1387_s13, 4  ;;  %p897_p0 = scmp.ge.s32.totalorder %s1385_s12, 1  ;;  %s265_s14 = int_to_ptr.vmem [resolvable:$true] %s264_s14 }
   0xe   : > { %p1753_p1 = scmp.eq.s32.totalorder %s1468_s15, 0  ;;  %p252_p2 = scmp.lt.s32.totalorder %s1385_s12, 3 }
   0xf   : > { %s1388_s17 = smov [#allocation8]   ;;  %s1389_s20 = smov [#allocation7]  }
  0x10   : > { %p1473_p3 = pnand %p897_p0, %p252_p2  ;;  %s296_s18 = sshll.u32 %s1388_s17, 4  ;;  %s1486_s18 = int_to_ptr.vmem [resolvable:$true] %s296_s18 }
  0x11   : > { %s280_s21 = sshll.u32 %s1389_s20, 4  ;;  %s1192_s22 = scalar_lea.vmem %s265_s14, 384  ;;  %s1488_s21 = int_to_ptr.vmem [resolvable:$true] %s280_s21 }
  0x12   : > { %s1761_s16 = scalar_select %p1473_p3, 1, 0 }
  0x13   : > { %p1110_p5 = pneg %p1473_p3  ;;  %p1193_p8 = scmp.ne.s32.totalorder %s265_s14, %s1192_s22 }
  0x14   : > { %p1200_p11 = scmp.lt.s32.totalorder %s265_s14, %s265_s14  ;;  %p1201_p12 = scmp.lt.s32.totalorder %s1192_s22, %s1192_s22 }
  0x15   : > { %p1482_p6 = pnand %p1110_p5, %p1753_p1 }
  0x16   : > { %p1202_p13 = por %p1201_p12, %p1200_p11 }
  0x17   : > { %p1183_p7 = pneg %p1482_p6 }
  0x19   : > { %p1195_p9 = pnand %p1193_p8, %p1183_p7 }
  0x1b   : > { %p1196_p10 = pneg %p1195_p9 }
  0x1d   : > { %p1203_p0 = pnand %p1202_p13, %p1196_p10 }
  0x1f   : > { %1206 = shalt.err (!%p1203_p0)
}
  0x20   : > { %s1390_s23 = smov 128   ;;  %s1391_s24 = smov 8  }
  0x21   : > { %s1763_s1 = sld [smem:[#allocation16_spill]]  ;;  %s1218_s27 = scalar_lea.vmem %s1486_s18, 2048 }
  0x22   : > { %p1219_p2 = scmp.ne.s32.totalorder %s1486_s18, %s1218_s27  ;;  %p1226_p9 = scmp.lt.s32.totalorder %s1486_s18, %s1486_s18 }
  0x23   : > { %p1227_p10 = scmp.lt.s32.totalorder %s1218_s27, %s1218_s27 }
  0x24   : > { %p1221_p5 = pnand %p1219_p2, %p1183_p7 }
  0x25   : > { %p1228_p11 = por %p1227_p10, %p1226_p9 }
  0x26   : > { %p1222_p8 = pneg %p1221_p5 }
  0x27   : > { %1113 = dma.hbm_to_vmem [thread:$0]  (!%p1482_p6), %s1763_s1, 384, %s265_s14, [#allocation6], %s1390_s23, %s1390_s23, %s1391_s24  }
  0x28   : > { %p1229_p12 = pnand %p1228_p11, %p1222_p8 }
  0x2a   : > { %1232 = shalt.err (!%p1229_p12)
}
  0x2b   : > { %s1764_s5 = sld [smem:[#allocation18_spill]]  ;;  %s1244_s13 = scalar_lea.vmem %s1488_s21, 2048 }
  0x2c   : > { %p1245_p13 = scmp.ne.s32.totalorder %s1488_s21, %s1244_s13  ;;  %p1252_p5 = scmp.lt.s32.totalorder %s1488_s21, %s1488_s21 }
  0x2d   : > { %p1253_p8 = scmp.lt.s32.totalorder %s1244_s13, %s1244_s13 }
  0x2e   : > { %p1247_p0 = pnand %p1245_p13, %p1183_p7 }
  0x2f   : > { %p1254_p9 = por %p1253_p8, %p1252_p5 }
  0x30   : > { %p1248_p2 = pneg %p1247_p0 }
  0x31   : > { %1119 = dma.hbm_to_vmem [thread:$0]  (!%p1482_p6), %s1764_s5, 2048, %s1486_s18, [#allocation9], %s1390_s23, %s1390_s23, %s1391_s24  }
  0x32   : > { %p1255_p10 = pnand %p1254_p9, %p1248_p2 }
  0x34   : > { %1258 = shalt.err (!%p1255_p10)
}
  0x35   : > { %s1765_s3 = sld [smem:[#allocation17_spill]]  ;;  %s1392_s18 = smov [#allocation10]  }
  0x36   : > { %s312_s20 = sshll.u32 %s1392_s18, 4  ;;  %s313_s20 = int_to_ptr.vmem [resolvable:$true] %s312_s20 }
  0x37   : > { %s1270_s22 = scalar_lea.vmem %s313_s20, 2048  ;;  %p1278_p0 = scmp.lt.s32.totalorder %s313_s20, %s313_s20 }
  0x38   : > { %p1271_p11 = scmp.ne.s32.totalorder %s313_s20, %s1270_s22  ;;  %p1279_p2 = scmp.lt.s32.totalorder %s1270_s22, %s1270_s22 }
  0x3a   : > { %p1273_p12 = pnand %p1271_p11, %p1183_p7  ;;  %p1280_p5 = por %p1279_p2, %p1278_p0 }
  0x3b   : > { %1116 = dma.hbm_to_vmem [thread:$0]  (!%p1482_p6), %s1765_s3, 2048, %s1488_s21, [#allocation6], %s1390_s23, %s1390_s23, %s1391_s24  }
  0x3c   : > { %p1274_p13 = pneg %p1273_p12 }
  0x3e   : > { %p1281_p8 = pnand %p1280_p5, %p1274_p13 }
  0x40   : > { %1284 = shalt.err (!%p1281_p8)
}
  0x41   : > { %s1766_s7 = sld [smem:[#allocation19_spill]]  ;;  %s896_s19 = sadd.s32 4294967294, %s1385_s12  }
  0x42   : > { %s1548_s26 = sadd.s32 1, %s1385_s12   ;;  %s34_s28 = sadd.s32 1, %s1381_s11 }
  0x43   : > { %s31_s27 = ssub.s32 %s1385_s12, %s1548_s26  ;;  %p41_p9 = scmp.ne.s32.totalorder %s1381_s11, %s1377_s10 }
  0x44   : > { %p32_p7 = scmp.eq.s32.totalorder %s31_s27, 0  ;;  %p42_p10 = scmp.eq.s32.totalorder %s1385_s12, 0 }
  0x45   : > { %p47_p11 = scmp.ne.s32.totalorder %s1377_s10, %s1373_s30  ;;  %p239_p13 = scmp.eq.s32.totalorder %s1468_s15, 1 }
  0x46   : > { %s1559_s29 = scalar_select %p32_p7, %s1381_s11, %s34_s28  }
  0x47   : > { %1122 = dma.hbm_to_vmem [thread:$0]  (!%p1482_p6), %s1766_s7, 2048, %s313_s20, [#allocation9], %s1390_s23, %s1390_s23, %s1391_s24  }
  0x48   : > { %p1561_p12 = por %p42_p10, %p41_p9  ;;  %p1567_p6 = por %p1753_p1, %p47_p11 }
  0x49   : > { %p245_p0 = scmp.eq.s32.totalorder %s896_s19, 1  ;;  %p1135_p2 = scmp.lt.s32.totalorder %s1385_s12, 2 }
  0x4a   : > { %s1768_s23 = scalar_select %p1567_p6, 1, 0 }
  0x4b   : > { %s329_s24 = sand.u32 1, %s1381_s11   ;;  %p1574_p5 = por %p239_p13, %p41_p9 }
  0x4c   : > { %p1578_p8 = por %p245_p0, %p47_p11  ;;  %s903_s18 = sshll.u32 %s329_s24, 3 }
  0x4d   : > { %s1769_s14 = scalar_select %p1574_p5, 1, 0 }
  0x4e   : > { %s1770_s17 = scalar_select %p1578_p8, 1, 0 }
  0x4f   : > { %s904_s20 = sshll.u32 %s1385_s12, 7  ;;  %s333_s19 = scalar_lea.vmem [#allocation2], %s903_s18 }
  0x50   : > { %s1586_s25 = scalar_lea.hbm %s1743_s0, %s904_s20  ;;  %s340_s27 = sshll.u32 %s333_s19, 4  ;;  %s341_s27 = int_to_ptr.vmem [resolvable:$true] %s340_s27 }
  0x51   : > { %p1590_p7 = pnand %p1135_p2, %p1561_p12  ;;  %s330_s1 = scalar_lea.sflag [#allocation3], %s329_s24 }
  0x52   : > { %s1285_s3 = scalar_lea.hbm %s1586_s25, 128  ;;  %s1290_s21 = scalar_lea.hbm %s1743_s0, 256 }
  0x53   : > { %p1286_p9 = scmp.ne.s32.totalorder %s1586_s25, %s1285_s3  ;;  %p1287_p10 = pneg %p1590_p7 }
  0x54   : > { %p1291_p0 = scmp.lt.s32.totalorder %s1586_s25, %s1743_s0  ;;  %p1292_p12 = scmp.lt.s32.totalorder %s1290_s21, %s1285_s3 }
  0x55   : > { %p1288_p11 = pnand %p1287_p10, %p1286_p9 }
  0x56   : > { %p1293_p2 = por %p1292_p12, %p1291_p0 }
  0x57   : > { %p1289_p13 = pneg %p1288_p11 }
  0x59   : > { %p1294_p4 = pnand %p1293_p2, %p1289_p13 }
  0x5b   : > { %1297 = shalt.err (!%p1294_p4)
}
  0x5c   : > { %s1298_s13 = scalar_lea.vmem %s341_s27, 128  ;;  %s1393_s24 = smov [#allocation2]  }
  0x5d   : > { %p1299_p1 = scmp.ne.s32.totalorder %s341_s27, %s1298_s13  ;;  %s1303_s5 = sshll.u32 %s1393_s24, 4  ;;  %s1304_s5 = int_to_ptr.vmem [resolvable:$false] %s1303_s5 }
  0x5e   : > { %s1305_s7 = scalar_lea.vmem %s1304_s5, 256  ;;  %p1306_p9 = scmp.lt.s32.totalorder %s341_s27, %s1304_s5 }
  0x5f   : > { %p1301_p8 = pnand %p1299_p1, %p1287_p10  ;;  %p1307_p11 = scmp.lt.s32.totalorder %s1305_s7, %s1298_s13 }
  0x61   : > { %p1302_p5 = pneg %p1301_p8  ;;  %p1308_p6 = por %p1307_p11, %p1306_p9 }
  0x63   : > { %p1309_p3 = pnand %p1308_p6, %p1302_p5 }
  0x65   : > { %1312 = shalt.err (!%p1309_p3)
}
  0x66   : > { %1126 = dma.hbm_to_vmem [thread:$0]  (!%p1590_p7), %s1586_s25, 128, %s341_s27, %s330_s1  }
  0x67   : > { %p1772_p13 = scmp.ne.s32.totalorder %s1761_s16, 0 }
  0x68   : > { %s1611_s3 = sand.u32 (!%p1772_p13), 1, %s1377_s10   ;;  %p1773_p1 = scmp.ne.s32.totalorder (!%p1772_p13), %s1768_s23, 0 }
  0x69   : > { %349 = sbr.rel (%p1772_p13) target bundleno = 924 (0x39c), region = 56  ;;  %s906_s20 = sshll.u32 (!%p1772_p13), %s1611_s3, 3 }
  0x6a   : > { %s352_s5 = scalar_lea.sflag (!%p1772_p13), [#allocation3], %s1611_s3  ;;  %s355_s7 = scalar_lea.vmem (!%p1772_p13), [#allocation2], %s906_s20 }
  0x6e   : > { %1356 = dma.done.wait (%p1773_p1), %s352_s5, 128  }
  0x6f   : > { %1358 = vsyncadd (%p1773_p1), %s352_s5, 4294967168  ;;  %p1774_p3 = scmp.eq.s32.totalorder %s1468_s15, 0 }
  0x71   : > { %1360 = dma.done.wait (%p1774_p3), [#allocation6], 2432   ;;  %p1775_p4 = pmov %p1774_p3 }
  0x72   : > { %p1776_p6 = pmov %p1774_p3 }
  0x73   : > { %1362 = vsyncadd (%p1775_p4), [#allocation6], 4294964864 }
  0x74   : > { %1364 = dma.done.wait (%p1776_p6), [#allocation9], 4096   ;;  %p1777_p5 = pmov %p1774_p3 }
  0x75   : > { %v1394_v0 = vmov 0.0   ;;  %vm1395_vm0 = vmmov 0   ;;  %v409_v1 = vld [vmem:[#allocation5 + $0x10] sm:$0xff]  ;;  %v408_v2 = vld [vmem:[#allocation5 + $0x8] sm:$0xff]  ;;  %v407_v5 = vld [vmem:[#allocation5] sm:$0xff]  ;;  %vm417_vm1 = vcmask 195584  }
  0x76   : > { %1366 = vsyncadd (%p1777_p5), [#allocation9], 4294963200  ;;  %976 = vmatprep.subr.mxu0 %v1394_v0  ;;  %982 = vmatprep.mubr.msk.f32.mxu0 %vm1395_vm0, %v1394_v0  ;;  %v507_v3 = vld [vmem:[#allocation7 + $0x78] sm:$0xff]  ;;  %v506_v4 = vld [vmem:[#allocation7 + $0x70] sm:$0xff]  ;;  %s918_s18 = sshll.u32 %s1468_s15, 7  ;;  %s405_s19 = scalar_lea.vmem [#allocation11], %s906_s20 }
  0x77   : > { %985 = vmatprep.subr.mxu1 %v1394_v0  ;;  %1017 = vmatprep.mubr.msk.f32.mxu1 %vm1395_vm0, %v1394_v0  ;;  %v406_v6 = vld [vmem:[%s355_s7] sm:$0xff]  ;;  %v505_v7 = vld [vmem:[#allocation7 + $0x68] sm:$0xff]  ;;  %v502_v10 = vld [vmem:[#allocation7 + $0x50] sm:$0xff]  ;;  %s788_s13 = sshll.u32 %s405_s19, 4  ;;  %s1706_s7 = scalar_lea.hbm %s1752_s9, %s918_s18  ;;  %s789_s13 = int_to_ptr.vmem [resolvable:$true] %s788_s13 }
  0x78   : > { %977 = vmatpush3.msra.mxu0 %v409_v1  ;;  %986 = vmatpush3.msra.mxu1 %v507_v3  ;;  %v504_v8 = vld [vmem:[#allocation7 + $0x60] sm:$0xff]  ;;  %v503_v9 = vld [vmem:[#allocation7 + $0x58] sm:$0xff]  ;;  %v501_v11 = vld [vmem:[#allocation7 + $0x48] sm:$0xff]  ;;  %s775_s1 = scalar_lea.sflag [#allocation4], %s1611_s3  ;;  %s1313_s16 = scalar_lea.vmem %s789_s13, 128 }
  0x79   : > { %978 = vmatprep.subr.mxu0 %v1394_v0  ;;  %987 = vmatprep.subr.mxu1 %v1394_v0  ;;  %v500_v12 = vld [vmem:[#allocation7 + $0x40] sm:$0xff]  ;;  %v499_v13 = vld [vmem:[#allocation7 + $0x38] sm:$0xff]  ;;  %v498_v14 = vld [vmem:[#allocation7 + $0x30] sm:$0xff]  ;;  %p1314_p8 = scmp.ne.s32.totalorder %s789_s13, %s1313_s16  ;;  %p1778_p7 = scmp.ne.s32.totalorder %s1769_s14, 0 }
  0x7a   : > { %979 = vmatpush3.msra.mxu0 %v408_v2  ;;  %988 = vmatpush3.msra.mxu1 %v506_v4  ;;  %v497_v15 = vld [vmem:[#allocation7 + $0x28] sm:$0xff]  ;;  %v496_v16 = vld [vmem:[#allocation7 + $0x20] sm:$0xff]  ;;  %v495_v17 = vld [vmem:[#allocation7 + $0x18] sm:$0xff]  ;;  %s1396_s15 = smov [#allocation11]  }
  0x7b   : > { %980 = vmatprep.subr.mxu0 %v1394_v0  ;;  %989 = vmatprep.subr.mxu1 %v1394_v0  ;;  %v494_v18 = vld [vmem:[#allocation7 + $0x10] sm:$0xff]  ;;  %v493_v19 = vld [vmem:[#allocation7 + $0x8] sm:$0xff]  ;;  %v492_v20 = vld [vmem:[#allocation7] sm:$0xff]  ;;  %p1315_p10 = pnand %p1314_p8, %p1778_p7  ;;  %s1317_s23 = sshll.u32 %s1396_s15, 4  ;;  %s1318_s23 = int_to_ptr.vmem [resolvable:$false] %s1317_s23 }
  0x7c   : > { %981 = vmatpush3.msra.mxu0 %v407_v5  ;;  %990 = vmatpush3.msra.mxu1 %v505_v7  ;;  %v601_v21 = vld [vmem:[#allocation8 + $0x78] sm:$0xff]  ;;  %v600_v22 = vld [vmem:[#allocation8 + $0x70] sm:$0xff]  ;;  %v599_v23 = vld [vmem:[#allocation8 + $0x68] sm:$0xff]  ;;  %s1319_s20 = scalar_lea.vmem %s1318_s23, 256  ;;  %p1320_p12 = scmp.lt.s32.totalorder %s789_s13, %s1318_s23 }
  0x7d   : > { %983 = vmatmul.mubr.msk.f32.vlgmr.msra.gmra.mxu0 %vm417_vm1, %v406_v6  ;;  %991 = vmatprep.subr.mxu1 %v1394_v0  ;;  %v598_v24 = vld [vmem:[#allocation8 + $0x60] sm:$0xff]  ;;  %v597_v25 = vld [vmem:[#allocation8 + $0x58] sm:$0xff]  ;;  %v596_v26 = vld [vmem:[#allocation8 + $0x50] sm:$0xff]  ;;  %p1316_p0 = pneg %p1315_p10  ;;  %p1321_p2 = scmp.lt.s32.totalorder %s1319_s20, %s1313_s16 }
  0x7e   : > { %1020 = vmatprep.subr.mxu0 %v1394_v0  ;;  %992 = vmatpush3.msra.mxu1 %v504_v8  ;;  %v595_v27 = vld [vmem:[#allocation8 + $0x48] sm:$0xff]  ;;  %v594_v28 = vld [vmem:[#allocation8 + $0x40] sm:$0xff]  ;;  %v593_v29 = vld [vmem:[#allocation8 + $0x38] sm:$0xff] }
  0x7f   : > { %1052 = vmatprep.mubr.msk.f32.mxu0 %vm1395_vm0, %v1394_v0  ;;  %993 = vmatprep.subr.mxu1 %v1394_v0  ;;  %v592_v30 = vld [vmem:[#allocation8 + $0x30] sm:$0xff]  ;;  %v591_v31 = vld [vmem:[#allocation8 + $0x28] sm:$0xff]  ;;  %v590_v32 = vld [vmem:[#allocation8 + $0x20] sm:$0xff]  ;;  %p1322_p9 = por %p1321_p2, %p1320_p12 }
  0x80   : > { %994 = vmatpush3.msra.mxu1 %v503_v9  ;;  %1021 = vmatpush3.msra.mxu0 %v601_v21  ;;  %v589_v33 = vld [vmem:[#allocation8 + $0x18] sm:$0xff]  ;;  %v588_v39 = vld [vmem:[#allocation8 + $0x10] sm:$0xff]  ;;  %v587_v40 = vld [vmem:[#allocation8 + $0x8] sm:$0xff] }
  0x81   : > { %995 = vmatprep.subr.mxu1 %v1394_v0  ;;  %1022 = vmatprep.subr.mxu0 %v1394_v0  ;;  %v912_v34 = vld [vmem:[%s1745_s2] ss:$0 sm:$0xff]  ;;  %v586_v41 = vld [vmem:[#allocation8] sm:$0xff]  ;;  %v694_v43 = vld [vmem:[#allocation10 + $0x70] sm:$0xff]  ;;  %p1323_p11 = pnand %p1322_p9, %p1316_p0 }
  0x82   : > { %996 = vmatpush3.msra.mxu1 %v502_v10  ;;  %1023 = vmatpush3.msra.mxu0 %v600_v22  ;;  %v695_v42 = vld [vmem:[#allocation10 + $0x78] sm:$0xff]  ;;  %v693_v44 = vld [vmem:[#allocation10 + $0x68] sm:$0xff]  ;;  %v692_v45 = vld [vmem:[#allocation10 + $0x60] sm:$0xff] }
  0x83   : > { %997 = vmatprep.subr.mxu1 %v1394_v0  ;;  %1024 = vmatprep.subr.mxu0 %v1394_v0  ;;  %v691_v46 = vld [vmem:[#allocation10 + $0x58] sm:$0xff]  ;;  %v690_v47 = vld [vmem:[#allocation10 + $0x50] sm:$0xff]  ;;  %v689_v48 = vld [vmem:[#allocation10 + $0x48] sm:$0xff] }
  0x84   : > { %998 = vmatpush3.msra.mxu1 %v501_v11  ;;  %1025 = vmatpush3.msra.mxu0 %v599_v23  ;;  %v688_v49 = vld [vmem:[#allocation10 + $0x40] sm:$0xff]  ;;  %v687_v50 = vld [vmem:[#allocation10 + $0x38] sm:$0xff]  ;;  %v686_v51 = vld [vmem:[#allocation10 + $0x30] sm:$0xff] }
  0x85   : > { %999 = vmatprep.subr.mxu1 %v1394_v0  ;;  %1026 = vmatprep.subr.mxu0 %v1394_v0  ;;  %v685_v52 = vld [vmem:[#allocation10 + $0x28] sm:$0xff]  ;;  %v684_v53 = vld [vmem:[#allocation10 + $0x20] sm:$0xff]  ;;  %v683_v54 = vld [vmem:[#allocation10 + $0x18] sm:$0xff] }
  0x86   : > { %1000 = vmatpush3.msra.mxu1 %v500_v12  ;;  %1027 = vmatpush3.msra.mxu0 %v598_v24  ;;  %v914_v55 = vld [vmem:[%s1747_s4] ss:$0 sm:$0xff]  ;;  %v682_v60 = vld [vmem:[#allocation10 + $0x10] sm:$0xff]  ;;  %v681_v61 = vld [vmem:[#allocation10 + $0x8] sm:$0xff] }
  0x87   : > { %1001 = vmatprep.subr.mxu1 %v1394_v0  ;;  %1028 = vmatprep.subr.mxu0 %v1394_v0  ;;  %v680_v62 = vld [vmem:[#allocation10] sm:$0xff]  ;;  %v915_v63 = vld [vmem:[%s1749_s6] ss:$0 sm:$0xff] }
  0x88   : > { %1002 = vmatpush3.msra.mxu1 %v499_v13  ;;  %1029 = vmatpush3.msra.mxu0 %v597_v25  ;;  %v916_v5 = vld [vmem:[%s1751_s8] ss:$0 sm:$0xff] }
  0x89   : > { %1003 = vmatprep.subr.mxu1 %v1394_v0  ;;  %1030 = vmatprep.subr.mxu0 %v1394_v0 }
  0x8a   : > { %1004 = vmatpush3.msra.mxu1 %v498_v14  ;;  %1031 = vmatpush3.msra.mxu0 %v596_v26 }
  0x8b   : > { %1005 = vmatprep.subr.mxu1 %v1394_v0  ;;  %1032 = vmatprep.subr.mxu0 %v1394_v0 }
  0x8c   : > { %1006 = vmatpush3.msra.mxu1 %v497_v15  ;;  %1033 = vmatpush3.msra.mxu0 %v595_v27 }
  0x8d   : > { %1007 = vmatprep.subr.mxu1 %v1394_v0  ;;  %1034 = vmatprep.subr.mxu0 %v1394_v0 }
  0x8e   : > { %1008 = vmatpush3.msra.mxu1 %v496_v16  ;;  %1035 = vmatpush3.msra.mxu0 %v594_v28 }
  0x8f   : > { %1009 = vmatprep.subr.mxu1 %v1394_v0  ;;  %1036 = vmatprep.subr.mxu0 %v1394_v0 }
  0x90   : > { %1010 = vmatpush3.msra.mxu1 %v495_v17  ;;  %1037 = vmatpush3.msra.mxu0 %v593_v29 }
  0x91   : > { %1011 = vmatprep.subr.mxu1 %v1394_v0  ;;  %1038 = vmatprep.subr.mxu0 %v1394_v0 }
  0x92   : > { %1012 = vmatpush3.msra.mxu1 %v494_v18  ;;  %1039 = vmatpush3.msra.mxu0 %v592_v30 }
  0x93   : > { %1013 = vmatprep.subr.mxu1 %v1394_v0  ;;  %1040 = vmatprep.subr.mxu0 %v1394_v0 }
  0x94   : > { %1014 = vmatpush3.msra.mxu1 %v493_v19  ;;  %1041 = vmatpush3.msra.mxu0 %v591_v31 }
  0x95   : > { %1015 = vmatprep.subr.mxu1 %v1394_v0  ;;  %1042 = vmatprep.subr.mxu0 %v1394_v0 }
  0x96   : > { %1016 = vmatpush3.msra.mxu1 %v492_v20  ;;  %1043 = vmatpush3.msra.mxu0 %v590_v32 }
  0x97   : > { %1055 = vmatprep.subr.mxu1 %v1394_v0  ;;  %1044 = vmatprep.subr.mxu0 %v1394_v0 }
  0x98   : > { %1045 = vmatpush3.msra.mxu0 %v589_v33 }
  0x99   : > { %1046 = vmatprep.subr.mxu0 %v1394_v0 }
  0x9a   : > { %1047 = vmatpush3.msra.mxu0 %v588_v39 }
  0x9b   : > { %1048 = vmatprep.subr.mxu0 %v1394_v0 }
  0x9c   : > { %1049 = vmatpush3.msra.mxu0 %v587_v40 }
  0x9d   : > { %1050 = vmatprep.subr.mxu0 %v1394_v0 }
  0x9e   : > { %1051 = vmatpush3.msra.mxu0 %v586_v41 }
 0x13d   : > { %v487_v35 = vpop.f32.mrf.mxu0 }
 0x13e   : > { %v488_v36 = vadd.f32 %v912_v34, %v487_v35 }
 0x13f   : > { %v984_v37 = vpop.f32.mrf.mxu0 }
 0x140   : > { %v491_v38 = vmax.f32 %v488_v36, 0.0 }
 0x142   : > { %1018 = vmatmul.mubr.f32.vlgmr.msra.gmra.mxu1 %v491_v38 }
 0x143   : > { %1087 = vmatprep.mubr.msk.f32.mxu1 %vm1395_vm0, %v1394_v0  ;;  %1056 = vmatpush3.msra.mxu1 %v695_v42 }
 0x144   : > { %1057 = vmatprep.subr.mxu1 %v1394_v0 }
 0x145   : > { %1058 = vmatpush3.msra.mxu1 %v694_v43 }
 0x146   : > { %1059 = vmatprep.subr.mxu1 %v1394_v0 }
 0x147   : > { %1060 = vmatpush3.msra.mxu1 %v693_v44 }
 0x148   : > { %1061 = vmatprep.subr.mxu1 %v1394_v0 }
 0x149   : > { %1062 = vmatpush3.msra.mxu1 %v692_v45 }
 0x14a   : > { %1063 = vmatprep.subr.mxu1 %v1394_v0 }
 0x14b   : > { %1064 = vmatpush3.msra.mxu1 %v691_v46 }
 0x14c   : > { %1065 = vmatprep.subr.mxu1 %v1394_v0 }
 0x14d   : > { %1066 = vmatpush3.msra.mxu1 %v690_v47 }
 0x14e   : > { %1067 = vmatprep.subr.mxu1 %v1394_v0 }
 0x14f   : > { %1068 = vmatpush3.msra.mxu1 %v689_v48 }
 0x150   : > { %1069 = vmatprep.subr.mxu1 %v1394_v0 }
 0x151   : > { %1070 = vmatpush3.msra.mxu1 %v688_v49 }
 0x152   : > { %1071 = vmatprep.subr.mxu1 %v1394_v0 }
 0x153   : > { %1072 = vmatpush3.msra.mxu1 %v687_v50 }
 0x154   : > { %1073 = vmatprep.subr.mxu1 %v1394_v0 }
 0x155   : > { %1074 = vmatpush3.msra.mxu1 %v686_v51 }
 0x156   : > { %1075 = vmatprep.subr.mxu1 %v1394_v0 }
 0x157   : > { %1076 = vmatpush3.msra.mxu1 %v685_v52 }
 0x158   : > { %1077 = vmatprep.subr.mxu1 %v1394_v0 }
 0x159   : > { %1078 = vmatpush3.msra.mxu1 %v684_v53 }
 0x15a   : > { %1079 = vmatprep.subr.mxu1 %v1394_v0 }
 0x15b   : > { %1080 = vmatpush3.msra.mxu1 %v683_v54 }
 0x15c   : > { %1081 = vmatprep.subr.mxu1 %v1394_v0 }
 0x15d   : > { %1082 = vmatpush3.msra.mxu1 %v682_v60 }
 0x15e   : > { %1083 = vmatprep.subr.mxu1 %v1394_v0 }
 0x15f   : > { %1084 = vmatpush3.msra.mxu1 %v681_v61 }
 0x160   : > { %1085 = vmatprep.subr.mxu1 %v1394_v0 }
 0x161   : > { %1086 = vmatpush3.msra.mxu1 %v680_v62 }
 0x202   : > { %v581_v56 = vpop.f32.mrf.mxu1 }
 0x203   : > { %v582_v57 = vadd.f32 %v914_v55, %v581_v56 }
 0x204   : > { %v1019_v58 = vpop.f32.mrf.mxu1 }
 0x205   : > { %v585_v59 = vmax.f32 %v582_v57, 0.0 }
 0x207   : > { %1053 = vmatmul.mubr.f32.vlgmr.msra.gmra.mxu0 %v585_v59 }
 0x2c7   : > { %v675_v1 = vpop.f32.mrf.mxu0 }
 0x2c8   : > { %v676_v2 = vadd.f32 %v915_v63, %v675_v1 }
 0x2c9   : > { %v1054_v3 = vpop.f32.mrf.mxu0 }
 0x2ca   : > { %v679_v4 = vmax.f32 %v676_v2, 0.0 }
 0x2cc   : > { %1088 = vmatmul.mubr.f32.vlgmr.msra.gmra.mxu1 %v679_v4 }
 0x38c   : > { %v769_v0 = vpop.f32.mrf.mxu1 }
 0x38d   : > { %v770_v6 = vadd.f32 %v916_v5, %v769_v0 }
 0x38e   : > { %v1089_v7 = vpop.f32.mrf.mxu1 }
 0x38f   : > { %773 = vst [vmem:[%s405_s19] sm:$0xff] %v770_v6 }
 0x390   : > { %1326 = shalt.err (!%p1323_p11)
}
 0x391   : > { %s1327_s25 = scalar_lea.hbm %s1706_s7, 128  ;;  %s1331_s28 = scalar_lea.hbm %s1752_s9, 256 }
 0x392   : > { %p1328_p13 = scmp.ne.s32.totalorder %s1706_s7, %s1327_s25  ;;  %p1332_p4 = scmp.lt.s32.totalorder %s1706_s7, %s1752_s9 }
 0x393   : > { %p1333_p6 = scmp.lt.s32.totalorder %s1331_s28, %s1327_s25 }
 0x394   : > { %p1329_p1 = pnand %p1328_p13, %p1778_p7 }
 0x395   : > { %p1334_p5 = por %p1333_p6, %p1332_p4 }
 0x396   : > { %p1330_p3 = pneg %p1329_p1 }
 0x398   : > { %p1335_p8 = pnand %p1334_p5, %p1330_p3 }
 0x39a   : > { %1338 = shalt.err (!%p1335_p8)
}
 0x39b   : > { %1108 = dma.vmem_to_hbm [thread:$0]  (%p1778_p7), %s789_s13, 128, %s1706_s7, %s775_s1  }
 0x39c PF: > { %s800_s18 = sand.u32 1, %s1373_s30   ;;  %p1779_p10 = scmp.ne.s32.totalorder %s1770_s17, 0 }
 0x39d   : > { %p1780_p0 = scmp.ge.s32.totalorder %s1385_s12, 2  ;;  %s801_s19 = scalar_lea.sflag [#allocation4], %s800_s18 }
 0x39f   : > { %p1128_p12 = pnand %p1780_p0, %p1779_p10 }
 0x3a1   : > { %p1129_p2 = pneg %p1128_p12 }
 0x3a3   : > { %1368 = dma.done.wait (%p1129_p2), %s801_s19, 128  }
 0x3a4   : > { %1370 = vsyncadd (%p1129_p2), %s801_s19, 4294967168  ;;  %p24_p9 = scmp.ge.s32.totalorder %s1548_s26, 4   ;;  %s1781_s30 = smov %s1377_s10 }
 0x3a5   : > { %s1782_s10 = smov %s1381_s11  ;;  %s1783_s11 = smov %s1559_s29 }
 0x3a6   : > { %s1784_s12 = smov %s1548_s26  ;;  %26 = sbr.rel (!%p24_p9) target bundleno = 12 (0xc), region = 117 }
 0x3ab   :  { %806 = vsyncpa [#allocation3], 1 }
 0x3ac   :  { %808 = vsyncpa [#allocation3 + $0x1], 1 }
 0x3ad   :  { %809 = vsyncpa [#allocation6], 1 }
 0x3ae   :  { %810 = vsyncpa [#allocation9], 1 }
 0x3af   :  { %811 = vsyncpa [#allocation4], 1 }
 0x3b0   :  { %813 = vsyncpa [#allocation4 + $0x1], 1 }

// kernel: tpu_custom_call.1
= control target key start
LH: loop header
LB: loop body
LE: loop exit
PB: predicated region body
PF: predicated region fallthrough
CT: control target
= control target key end

     0   :  { %s1743_s0 = inlined_call_operand.hbm [shape: f32[16,24], index: 0, kind: input, shape index: {}]   ;;  %s1744_s1 = inlined_call_operand.hbm [shape: f32[24,128], index: 1, kind: input, shape index: {}]   ;;  %s1745_s2 = inlined_call_operand.vmem [shape: f32[1,128], index: 2, kind: input, shape index: {}]   ;;  %s1746_s3 = inlined_call_operand.hbm [shape: f32[128,128], index: 3, kind: input, shape index: {}]   ;;  %s1747_s4 = inlined_call_operand.vmem [shape: f32[1,128], index: 4, kind: input, shape index: {}]   ;;  %s1748_s5 = inlined_call_operand.hbm [shape: f32[128,128], index: 5, kind: input, shape index: {}]   ;;  %s1749_s6 = inlined_call_operand.vmem [shape: f32[1,128], index: 6, kind: input, shape index: {}]   ;;  %s1750_s7 = inlined_call_operand.hbm [shape: f32[128,128], index: 7, kind: input, shape index: {}]   ;;  %s1751_s8 = inlined_call_operand.vmem [shape: f32[1,128], index: 8, kind: input, shape index: {}]   ;;  %s1752_s9 = inlined_call_operand.hbm [shape: f32[16,128], index: 9, kind: output, shape index: {}]  }
   0x1   :  { %1757 = sst [smem:[#allocation16_spill]] %s1744_s1 }
   0x2   :  { %1758 = sst [smem:[#allocation17_spill]] %s1746_s3 }
   0x3   :  { %1759 = sst [smem:[#allocation18_spill]] %s1748_s5 }
   0x4   :  { %1760 = sst [smem:[#allocation19_spill]] %s1750_s7 }
   0x5   :  { %14 = vsyncpa [#allocation3], 0 }
   0x6   :  { %16 = vsyncpa [#allocation3 + $0x1], 0 }
   0x7   :  { %17 = vsyncpa [#allocation6], 0 }
   0x8   :  { %18 = vsyncpa [#allocation9], 0 }
   0x9   :  { %19 = vsyncpa [#allocation4], 0 }
   0xa   :  { %21 = vsyncpa [#allocation4 + $0x1], 0  ;;  %s1447_s30 = smov 0   ;;  %s1449_s10 = smov 0  }
   0xb   :  { %s1451_s11 = smov 0   ;;  %s1453_s12 = smov 0  }
   0xc LB: > { %s1387_s13 = smov [#allocation5]   ;;  %s1468_s15 = sadd.s32 4294967295, %s1385_s12   ;;  %s1385_s12 = sphi %s1453_s12, %s1784_s12   ;;  %s1381_s11 = sphi %s1451_s11, %s1783_s11   ;;  %s1377_s10 = sphi %s1449_s10, %s1782_s10   ;;  %s1373_s30 = sphi %s1447_s30, %s1781_s30  }
   0xd   : > { %s264_s14 = sshll.u32 %s1387_s13, 4  ;;  %p897_p0 = scmp.ge.s32.totalorder %s1385_s12, 1  ;;  %s265_s14 = int_to_ptr.vmem [resolvable:$true] %s264_s14 }
   0xe   : > { %p1753_p1 = scmp.eq.s32.totalorder %s1468_s15, 0  ;;  %p252_p2 = scmp.lt.s32.totalorder %s1385_s12, 3 }
   0xf   : > { %s1388_s17 = smov [#allocation8]   ;;  %s1389_s20 = smov [#allocation7]  }
  0x10   : > { %p1473_p3 = pnand %p897_p0, %p252_p2  ;;  %s296_s18 = sshll.u32 %s1388_s17, 4  ;;  %s1486_s18 = int_to_ptr.vmem [resolvable:$true] %s296_s18 }
  0x11   : > { %s280_s21 = sshll.u32 %s1389_s20, 4  ;;  %s1192_s22 = scalar_lea.vmem %s265_s14, 384  ;;  %s1488_s21 = int_to_ptr.vmem [resolvable:$true] %s280_s21 }
  0x12   : > { %s1761_s16 = scalar_select %p1473_p3, 1, 0 }
  0x13   : > { %p1110_p5 = pneg %p1473_p3  ;;  %p1193_p8 = scmp.ne.s32.totalorder %s265_s14, %s1192_s22 }
  0x14   : > { %p1200_p11 = scmp.lt.s32.totalorder %s265_s14, %s265_s14  ;;  %p1201_p12 = scmp.lt.s32.totalorder %s1192_s22, %s1192_s22 }
  0x15   : > { %p1482_p6 = pnand %p1110_p5, %p1753_p1 }
  0x16   : > { %p1202_p13 = por %p1201_p12, %p1200_p11 }
  0x17   : > { %p1183_p7 = pneg %p1482_p6 }
  0x19   : > { %p1195_p9 = pnand %p1193_p8, %p1183_p7 }
  0x1b   : > { %p1196_p10 = pneg %p1195_p9 }
  0x1d   : > { %p1203_p0 = pnand %p1202_p13, %p1196_p10 }
  0x1f   : > { %1206 = shalt.err (!%p1203_p0)
}
  0x20   : > { %s1390_s23 = smov 128   ;;  %s1391_s24 = smov 8  }
  0x21   : > { %s1763_s1 = sld [smem:[#allocation16_spill]]  ;;  %s1218_s27 = scalar_lea.vmem %s1486_s18, 2048 }
  0x22   : > { %p1219_p2 = scmp.ne.s32.totalorder %s1486_s18, %s1218_s27  ;;  %p1226_p9 = scmp.lt.s32.totalorder %s1486_s18, %s1486_s18 }
  0x23   : > { %p1227_p10 = scmp.lt.s32.totalorder %s1218_s27, %s1218_s27 }
  0x24   : > { %p1221_p5 = pnand %p1219_p2, %p1183_p7 }
  0x25   : > { %p1228_p11 = por %p1227_p10, %p1226_p9 }
  0x26   : > { %p1222_p8 = pneg %p1221_p5 }
  0x27   : > { %1113 = dma.hbm_to_vmem [thread:$0]  (!%p1482_p6), %s1763_s1, 384, %s265_s14, [#allocation6], %s1390_s23, %s1390_s23, %s1391_s24  }
  0x28   : > { %p1229_p12 = pnand %p1228_p11, %p1222_p8 }
  0x2a   : > { %1232 = shalt.err (!%p1229_p12)
}
  0x2b   : > { %s1764_s5 = sld [smem:[#allocation18_spill]]  ;;  %s1244_s13 = scalar_lea.vmem %s1488_s21, 2048 }
  0x2c   : > { %p1245_p13 = scmp.ne.s32.totalorder %s1488_s21, %s1244_s13  ;;  %p1252_p5 = scmp.lt.s32.totalorder %s1488_s21, %s1488_s21 }
  0x2d   : > { %p1253_p8 = scmp.lt.s32.totalorder %s1244_s13, %s1244_s13 }
  0x2e   : > { %p1247_p0 = pnand %p1245_p13, %p1183_p7 }
  0x2f   : > { %p1254_p9 = por %p1253_p8, %p1252_p5 }
  0x30   : > { %p1248_p2 = pneg %p1247_p0 }
  0x31   : > { %1119 = dma.hbm_to_vmem [thread:$0]  (!%p1482_p6), %s1764_s5, 2048, %s1486_s18, [#allocation9], %s1390_s23, %s1390_s23, %s1391_s24  }
  0x32   : > { %p1255_p10 = pnand %p1254_p9, %p1248_p2 }
  0x34   : > { %1258 = shalt.err (!%p1255_p10)
}
  0x35   : > { %s1765_s3 = sld [smem:[#allocation17_spill]]  ;;  %s1392_s18 = smov [#allocation10]  }
  0x36   : > { %s312_s20 = sshll.u32 %s1392_s18, 4  ;;  %s313_s20 = int_to_ptr.vmem [resolvable:$true] %s312_s20 }
  0x37   : > { %s1270_s22 = scalar_lea.vmem %s313_s20, 2048  ;;  %p1278_p0 = scmp.lt.s32.totalorder %s313_s20, %s313_s20 }
  0x38   : > { %p1271_p11 = scmp.ne.s32.totalorder %s313_s20, %s1270_s22  ;;  %p1279_p2 = scmp.lt.s32.totalorder %s1270_s22, %s1270_s22 }
  0x3a   : > { %p1273_p12 = pnand %p1271_p11, %p1183_p7  ;;  %p1280_p5 = por %p1279_p2, %p1278_p0 }
  0x3b   : > { %1116 = dma.hbm_to_vmem [thread:$0]  (!%p1482_p6), %s1765_s3, 2048, %s1488_s21, [#allocation6], %s1390_s23, %s1390_s23, %s1391_s24  }
  0x3c   : > { %p1274_p13 = pneg %p1273_p12 }
  0x3e   : > { %p1281_p8 = pnand %p1280_p5, %p1274_p13 }
  0x40   : > { %1284 = shalt.err (!%p1281_p8)
}
  0x41   : > { %s1766_s7 = sld [smem:[#allocation19_spill]]  ;;  %s896_s19 = sadd.s32 4294967294, %s1385_s12  }
  0x42   : > { %s1548_s26 = sadd.s32 1, %s1385_s12   ;;  %s34_s28 = sadd.s32 1, %s1381_s11 }
  0x43   : > { %s31_s27 = ssub.s32 %s1385_s12, %s1548_s26  ;;  %p41_p9 = scmp.ne.s32.totalorder %s1381_s11, %s1377_s10 }
  0x44   : > { %p32_p7 = scmp.eq.s32.totalorder %s31_s27, 0  ;;  %p42_p10 = scmp.eq.s32.totalorder %s1385_s12, 0 }
  0x45   : > { %p47_p11 = scmp.ne.s32.totalorder %s1377_s10, %s1373_s30  ;;  %p239_p13 = scmp.eq.s32.totalorder %s1468_s15, 1 }
  0x46   : > { %s1559_s29 = scalar_select %p32_p7, %s1381_s11, %s34_s28  }
  0x47   : > { %1122 = dma.hbm_to_vmem [thread:$0]  (!%p1482_p6), %s1766_s7, 2048, %s313_s20, [#allocation9], %s1390_s23, %s1390_s23, %s1391_s24  }
  0x48   : > { %p1561_p12 = por %p42_p10, %p41_p9  ;;  %p1567_p6 = por %p1753_p1, %p47_p11 }
  0x49   : > { %p245_p0 = scmp.eq.s32.totalorder %s896_s19, 1  ;;  %p1135_p2 = scmp.lt.s32.totalorder %s1385_s12, 2 }
  0x4a   : > { %s1768_s23 = scalar_select %p1567_p6, 1, 0 }
  0x4b   : > { %s329_s24 = sand.u32 1, %s1381_s11   ;;  %p1574_p5 = por %p239_p13, %p41_p9 }
  0x4c   : > { %p1578_p8 = por %p245_p0, %p47_p11  ;;  %s903_s18 = sshll.u32 %s329_s24, 3 }
  0x4d   : > { %s1769_s14 = scalar_select %p1574_p5, 1, 0 }
  0x4e   : > { %s1770_s17 = scalar_select %p1578_p8, 1, 0 }
  0x4f   : > { %s904_s20 = sshll.u32 %s1385_s12, 7  ;;  %s333_s19 = scalar_lea.vmem [#allocation2], %s903_s18 }
  0x50   : > { %s1586_s25 = scalar_lea.hbm %s1743_s0, %s904_s20  ;;  %s340_s27 = sshll.u32 %s333_s19, 4  ;;  %s341_s27 = int_to_ptr.vmem [resolvable:$true] %s340_s27 }
  0x51   : > { %p1590_p7 = pnand %p1135_p2, %p1561_p12  ;;  %s330_s1 = scalar_lea.sflag [#allocation3], %s329_s24 }
  0x52   : > { %s1285_s3 = scalar_lea.hbm %s1586_s25, 128  ;;  %s1290_s21 = scalar_lea.hbm %s1743_s0, 256 }
  0x53   : > { %p1286_p9 = scmp.ne.s32.totalorder %s1586_s25, %s1285_s3  ;;  %p1287_p10 = pneg %p1590_p7 }
  0x54   : > { %p1291_p0 = scmp.lt.s32.totalorder %s1586_s25, %s1743_s0  ;;  %p1292_p12 = scmp.lt.s32.totalorder %s1290_s21, %s1285_s3 }
  0x55   : > { %p1288_p11 = pnand %p1287_p10, %p1286_p9 }
  0x56   : > { %p1293_p2 = por %p1292_p12, %p1291_p0 }
  0x57   : > { %p1289_p13 = pneg %p1288_p11 }
  0x59   : > { %p1294_p4 = pnand %p1293_p2, %p1289_p13 }
  0x5b   : > { %1297 = shalt.err (!%p1294_p4)
}
  0x5c   : > { %s1298_s13 = scalar_lea.vmem %s341_s27, 128  ;;  %s1393_s24 = smov [#allocation2]  }
  0x5d   : > { %p1299_p1 = scmp.ne.s32.totalorder %s341_s27, %s1298_s13  ;;  %s1303_s5 = sshll.u32 %s1393_s24, 4  ;;  %s1304_s5 = int_to_ptr.vmem [resolvable:$false] %s1303_s5 }
  0x5e   : > { %s1305_s7 = scalar_lea.vmem %s1304_s5, 256  ;;  %p1306_p9 = scmp.lt.s32.totalorder %s341_s27, %s1304_s5 }
  0x5f   : > { %p1301_p8 = pnand %p1299_p1, %p1287_p10  ;;  %p1307_p11 = scmp.lt.s32.totalorder %s1305_s7, %s1298_s13 }
  0x61   : > { %p1302_p5 = pneg %p1301_p8  ;;  %p1308_p6 = por %p1307_p11, %p1306_p9 }
  0x63   : > { %p1309_p3 = pnand %p1308_p6, %p1302_p5 }
  0x65   : > { %1312 = shalt.err (!%p1309_p3)
}
  0x66   : > { %1126 = dma.hbm_to_vmem [thread:$0]  (!%p1590_p7), %s1586_s25, 128, %s341_s27, %s330_s1  }
  0x67   : > { %p1772_p13 = scmp.ne.s32.totalorder %s1761_s16, 0 }
  0x68   : > { %s1611_s3 = sand.u32 (!%p1772_p13), 1, %s1377_s10   ;;  %p1773_p1 = scmp.ne.s32.totalorder (!%p1772_p13), %s1768_s23, 0 }
  0x69   : > { %349 = sbr.rel (%p1772_p13) target bundleno = 924 (0x39c), region = 56  ;;  %s906_s20 = sshll.u32 (!%p1772_p13), %s1611_s3, 3 }
  0x6a   : > { %s352_s5 = scalar_lea.sflag (!%p1772_p13), [#allocation3], %s1611_s3  ;;  %s355_s7 = scalar_lea.vmem (!%p1772_p13), [#allocation2], %s906_s20 }
  0x6e   : > { %1356 = dma.done.wait (%p1773_p1), %s352_s5, 128  }
  0x6f   : > { %1358 = vsyncadd (%p1773_p1), %s352_s5, 4294967168  ;;  %p1774_p3 = scmp.eq.s32.totalorder %s1468_s15, 0 }
  0x71   : > { %1360 = dma.done.wait (%p1774_p3), [#allocation6], 2432   ;;  %p1775_p4 = pmov %p1774_p3 }
  0x72   : > { %p1776_p6 = pmov %p1774_p3 }
  0x73   : > { %1362 = vsyncadd (%p1775_p4), [#allocation6], 4294964864 }
  0x74   : > { %1364 = dma.done.wait (%p1776_p6), [#allocation9], 4096   ;;  %p1777_p5 = pmov %p1774_p3 }
  0x75   : > { %v1394_v0 = vmov 0.0   ;;  %vm1395_vm0 = vmmov 0   ;;  %v409_v1 = vld [vmem:[#allocation5 + $0x10] sm:$0xff]  ;;  %v408_v2 = vld [vmem:[#allocation5 + $0x8] sm:$0xff]  ;;  %v407_v5 = vld [vmem:[#allocation5] sm:$0xff]  ;;  %vm417_vm1 = vcmask 195584  }
  0x76   : > { %1366 = vsyncadd (%p1777_p5), [#allocation9], 4294963200  ;;  %976 = vmatprep.subr.mxu0 %v1394_v0  ;;  %982 = vmatprep.mubr.msk.f32.mxu0 %vm1395_vm0, %v1394_v0  ;;  %v507_v3 = vld [vmem:[#allocation7 + $0x78] sm:$0xff]  ;;  %v506_v4 = vld [vmem:[#allocation7 + $0x70] sm:$0xff]  ;;  %s918_s18 = sshll.u32 %s1468_s15, 7  ;;  %s405_s19 = scalar_lea.vmem [#allocation11], %s906_s20 }
  0x77   : > { %985 = vmatprep.subr.mxu1 %v1394_v0  ;;  %1017 = vmatprep.mubr.msk.f32.mxu1 %vm1395_vm0, %v1394_v0  ;;  %v406_v6 = vld [vmem:[%s355_s7] sm:$0xff]  ;;  %v505_v7 = vld [vmem:[#allocation7 + $0x68] sm:$0xff]  ;;  %v502_v10 = vld [vmem:[#allocation7 + $0x50] sm:$0xff]  ;;  %s788_s13 = sshll.u32 %s405_s19, 4  ;;  %s1706_s7 = scalar_lea.hbm %s1752_s9, %s918_s18  ;;  %s789_s13 = int_to_ptr.vmem [resolvable:$true] %s788_s13 }
  0x78   : > { %977 = vmatpush3.msra.mxu0 %v409_v1  ;;  %986 = vmatpush3.msra.mxu1 %v507_v3  ;;  %v504_v8 = vld [vmem:[#allocation7 + $0x60] sm:$0xff]  ;;  %v503_v9 = vld [vmem:[#allocation7 + $0x58] sm:$0xff]  ;;  %v501_v11 = vld [vmem:[#allocation7 + $0x48] sm:$0xff]  ;;  %s775_s1 = scalar_lea.sflag [#allocation4], %s1611_s3  ;;  %s1313_s16 = scalar_lea.vmem %s789_s13, 128 }
  0x79   : > { %978 = vmatprep.subr.mxu0 %v1394_v0  ;;  %987 = vmatprep.subr.mxu1 %v1394_v0  ;;  %v500_v12 = vld [vmem:[#allocation7 + $0x40] sm:$0xff]  ;;  %v499_v13 = vld [vmem:[#allocation7 + $0x38] sm:$0xff]  ;;  %v498_v14 = vld [vmem:[#allocation7 + $0x30] sm:$0xff]  ;;  %p1314_p8 = scmp.ne.s32.totalorder %s789_s13, %s1313_s16  ;;  %p1778_p7 = scmp.ne.s32.totalorder %s1769_s14, 0 }
  0x7a   : > { %979 = vmatpush3.msra.mxu0 %v408_v2  ;;  %988 = vmatpush3.msra.mxu1 %v506_v4  ;;  %v497_v15 = vld [vmem:[#allocation7 + $0x28] sm:$0xff]  ;;  %v496_v16 = vld [vmem:[#allocation7 + $0x20] sm:$0xff]  ;;  %v495_v17 = vld [vmem:[#allocation7 + $0x18] sm:$0xff]  ;;  %s1396_s15 = smov [#allocation11]  }
  0x7b   : > { %980 = vmatprep.subr.mxu0 %v1394_v0  ;;  %989 = vmatprep.subr.mxu1 %v1394_v0  ;;  %v494_v18 = vld [vmem:[#allocation7 + $0x10] sm:$0xff]  ;;  %v493_v19 = vld [vmem:[#allocation7 + $0x8] sm:$0xff]  ;;  %v492_v20 = vld [vmem:[#allocation7] sm:$0xff]  ;;  %p1315_p10 = pnand %p1314_p8, %p1778_p7  ;;  %s1317_s23 = sshll.u32 %s1396_s15, 4  ;;  %s1318_s23 = int_to_ptr.vmem [resolvable:$false] %s1317_s23 }
  0x7c   : > { %981 = vmatpush3.msra.mxu0 %v407_v5  ;;  %990 = vmatpush3.msra.mxu1 %v505_v7  ;;  %v601_v21 = vld [vmem:[#allocation8 + $0x78] sm:$0xff]  ;;  %v600_v22 = vld [vmem:[#allocation8 + $0x70] sm:$0xff]  ;;  %v599_v23 = vld [vmem:[#allocation8 + $0x68] sm:$0xff]  ;;  %s1319_s20 = scalar_lea.vmem %s1318_s23, 256  ;;  %p1320_p12 = scmp.lt.s32.totalorder %s789_s13, %s1318_s23 }
  0x7d   : > { %983 = vmatmul.mubr.msk.f32.vlgmr.msra.gmra.mxu0 %vm417_vm1, %v406_v6  ;;  %991 = vmatprep.subr.mxu1 %v1394_v0  ;;  %v598_v24 = vld [vmem:[#allocation8 + $0x60] sm:$0xff]  ;;  %v597_v25 = vld [vmem:[#allocation8 + $0x58] sm:$0xff]  ;;  %v596_v26 = vld [vmem:[#allocation8 + $0x50] sm:$0xff]  ;;  %p1316_p0 = pneg %p1315_p10  ;;  %p1321_p2 = scmp.lt.s32.totalorder %s1319_s20, %s1313_s16 }
  0x7e   : > { %1020 = vmatprep.subr.mxu0 %v1394_v0  ;;  %992 = vmatpush3.msra.mxu1 %v504_v8  ;;  %v595_v27 = vld [vmem:[#allocation8 + $0x48] sm:$0xff]  ;;  %v594_v28 = vld [vmem:[#allocation8 + $0x40] sm:$0xff]  ;;  %v593_v29 = vld [vmem:[#allocation8 + $0x38] sm:$0xff] }
  0x7f   : > { %1052 = vmatprep.mubr.msk.f32.mxu0 %vm1395_vm0, %v1394_v0  ;;  %993 = vmatprep.subr.mxu1 %v1394_v0  ;;  %v592_v30 = vld [vmem:[#allocation8 + $0x30] sm:$0xff]  ;;  %v591_v31 = vld [vmem:[#allocation8 + $0x28] sm:$0xff]  ;;  %v590_v32 = vld [vmem:[#allocation8 + $0x20] sm:$0xff]  ;;  %p1322_p9 = por %p1321_p2, %p1320_p12 }
  0x80   : > { %994 = vmatpush3.msra.mxu1 %v503_v9  ;;  %1021 = vmatpush3.msra.mxu0 %v601_v21  ;;  %v589_v33 = vld [vmem:[#allocation8 + $0x18] sm:$0xff]  ;;  %v588_v39 = vld [vmem:[#allocation8 + $0x10] sm:$0xff]  ;;  %v587_v40 = vld [vmem:[#allocation8 + $0x8] sm:$0xff] }
  0x81   : > { %995 = vmatprep.subr.mxu1 %v1394_v0  ;;  %1022 = vmatprep.subr.mxu0 %v1394_v0  ;;  %v912_v34 = vld [vmem:[%s1745_s2] ss:$0 sm:$0xff]  ;;  %v586_v41 = vld [vmem:[#allocation8] sm:$0xff]  ;;  %v694_v43 = vld [vmem:[#allocation10 + $0x70] sm:$0xff]  ;;  %p1323_p11 = pnand %p1322_p9, %p1316_p0 }
  0x82   : > { %996 = vmatpush3.msra.mxu1 %v502_v10  ;;  %1023 = vmatpush3.msra.mxu0 %v600_v22  ;;  %v695_v42 = vld [vmem:[#allocation10 + $0x78] sm:$0xff]  ;;  %v693_v44 = vld [vmem:[#allocation10 + $0x68] sm:$0xff]  ;;  %v692_v45 = vld [vmem:[#allocation10 + $0x60] sm:$0xff] }
  0x83   : > { %997 = vmatprep.subr.mxu1 %v1394_v0  ;;  %1024 = vmatprep.subr.mxu0 %v1394_v0  ;;  %v691_v46 = vld [vmem:[#allocation10 + $0x58] sm:$0xff]  ;;  %v690_v47 = vld [vmem:[#allocation10 + $0x50] sm:$0xff]  ;;  %v689_v48 = vld [vmem:[#allocation10 + $0x48] sm:$0xff] }
  0x84   : > { %998 = vmatpush3.msra.mxu1 %v501_v11  ;;  %1025 = vmatpush3.msra.mxu0 %v599_v23  ;;  %v688_v49 = vld [vmem:[#allocation10 + $0x40] sm:$0xff]  ;;  %v687_v50 = vld [vmem:[#allocation10 + $0x38] sm:$0xff]  ;;  %v686_v51 = vld [vmem:[#allocation10 + $0x30] sm:$0xff] }
  0x85   : > { %999 = vmatprep.subr.mxu1 %v1394_v0  ;;  %1026 = vmatprep.subr.mxu0 %v1394_v0  ;;  %v685_v52 = vld [vmem:[#allocation10 + $0x28] sm:$0xff]  ;;  %v684_v53 = vld [vmem:[#allocation10 + $0x20] sm:$0xff]  ;;  %v683_v54 = vld [vmem:[#allocation10 + $0x18] sm:$0xff] }
  0x86   : > { %1000 = vmatpush3.msra.mxu1 %v500_v12  ;;  %1027 = vmatpush3.msra.mxu0 %v598_v24  ;;  %v914_v55 = vld [vmem:[%s1747_s4] ss:$0 sm:$0xff]  ;;  %v682_v60 = vld [vmem:[#allocation10 + $0x10] sm:$0xff]  ;;  %v681_v61 = vld [vmem:[#allocation10 + $0x8] sm:$0xff] }
  0x87   : > { %1001 = vmatprep.subr.mxu1 %v1394_v0  ;;  %1028 = vmatprep.subr.mxu0 %v1394_v0  ;;  %v680_v62 = vld [vmem:[#allocation10] sm:$0xff]  ;;  %v915_v63 = vld [vmem:[%s1749_s6] ss:$0 sm:$0xff] }
  0x88   : > { %1002 = vmatpush3.msra.mxu1 %v499_v13  ;;  %1029 = vmatpush3.msra.mxu0 %v597_v25  ;;  %v916_v5 = vld [vmem:[%s1751_s8] ss:$0 sm:$0xff] }
  0x89   : > { %1003 = vmatprep.subr.mxu1 %v1394_v0  ;;  %1030 = vmatprep.subr.mxu0 %v1394_v0 }
  0x8a   : > { %1004 = vmatpush3.msra.mxu1 %v498_v14  ;;  %1031 = vmatpush3.msra.mxu0 %v596_v26 }
  0x8b   : > { %1005 = vmatprep.subr.mxu1 %v1394_v0  ;;  %1032 = vmatprep.subr.mxu0 %v1394_v0 }
  0x8c   : > { %1006 = vmatpush3.msra.mxu1 %v497_v15  ;;  %1033 = vmatpush3.msra.mxu0 %v595_v27 }
  0x8d   : > { %1007 = vmatprep.subr.mxu1 %v1394_v0  ;;  %1034 = vmatprep.subr.mxu0 %v1394_v0 }
  0x8e   : > { %1008 = vmatpush3.msra.mxu1 %v496_v16  ;;  %1035 = vmatpush3.msra.mxu0 %v594_v28 }
  0x8f   : > { %1009 = vmatprep.subr.mxu1 %v1394_v0  ;;  %1036 = vmatprep.subr.mxu0 %v1394_v0 }
  0x90   : > { %1010 = vmatpush3.msra.mxu1 %v495_v17  ;;  %1037 = vmatpush3.msra.mxu0 %v593_v29 }
  0x91   : > { %1011 = vmatprep.subr.mxu1 %v1394_v0  ;;  %1038 = vmatprep.subr.mxu0 %v1394_v0 }
  0x92   : > { %1012 = vmatpush3.msra.mxu1 %v494_v18  ;;  %1039 = vmatpush3.msra.mxu0 %v592_v30 }
  0x93   : > { %1013 = vmatprep.subr.mxu1 %v1394_v0  ;;  %1040 = vmatprep.subr.mxu0 %v1394_v0 }
  0x94   : > { %1014 = vmatpush3.msra.mxu1 %v493_v19  ;;  %1041 = vmatpush3.msra.mxu0 %v591_v31 }
  0x95   : > { %1015 = vmatprep.subr.mxu1 %v1394_v0  ;;  %1042 = vmatprep.subr.mxu0 %v1394_v0 }
  0x96   : > { %1016 = vmatpush3.msra.mxu1 %v492_v20  ;;  %1043 = vmatpush3.msra.mxu0 %v590_v32 }
  0x97   : > { %1055 = vmatprep.subr.mxu1 %v1394_v0  ;;  %1044 = vmatprep.subr.mxu0 %v1394_v0 }
  0x98   : > { %1045 = vmatpush3.msra.mxu0 %v589_v33 }
  0x99   : > { %1046 = vmatprep.subr.mxu0 %v1394_v0 }
  0x9a   : > { %1047 = vmatpush3.msra.mxu0 %v588_v39 }
  0x9b   : > { %1048 = vmatprep.subr.mxu0 %v1394_v0 }
  0x9c   : > { %1049 = vmatpush3.msra.mxu0 %v587_v40 }
  0x9d   : > { %1050 = vmatprep.subr.mxu0 %v1394_v0 }
  0x9e   : > { %1051 = vmatpush3.msra.mxu0 %v586_v41 }
 0x13d   : > { %v487_v35 = vpop.f32.mrf.mxu0 }
 0x13e   : > { %v488_v36 = vadd.f32 %v912_v34, %v487_v35 }
 0x13f   : > { %v984_v37 = vpop.f32.mrf.mxu0 }
 0x140   : > { %v491_v38 = vmax.f32 %v488_v36, 0.0 }
 0x142   : > { %1018 = vmatmul.mubr.f32.vlgmr.msra.gmra.mxu1 %v491_v38 }
 0x143   : > { %1087 = vmatprep.mubr.msk.f32.mxu1 %vm1395_vm0, %v1394_v0  ;;  %1056 = vmatpush3.msra.mxu1 %v695_v42 }
 0x144   : > { %1057 = vmatprep.subr.mxu1 %v1394_v0 }
 0x145   : > { %1058 = vmatpush3.msra.mxu1 %v694_v43 }
 0x146   : > { %1059 = vmatprep.subr.mxu1 %v1394_v0 }
 0x147   : > { %1060 = vmatpush3.msra.mxu1 %v693_v44 }
 0x148   : > { %1061 = vmatprep.subr.mxu1 %v1394_v0 }
 0x149   : > { %1062 = vmatpush3.msra.mxu1 %v692_v45 }
 0x14a   : > { %1063 = vmatprep.subr.mxu1 %v1394_v0 }
 0x14b   : > { %1064 = vmatpush3.msra.mxu1 %v691_v46 }
 0x14c   : > { %1065 = vmatprep.subr.mxu1 %v1394_v0 }
 0x14d   : > { %1066 = vmatpush3.msra.mxu1 %v690_v47 }
 0x14e   : > { %1067 = vmatprep.subr.mxu1 %v1394_v0 }
 0x14f   : > { %1068 = vmatpush3.msra.mxu1 %v689_v48 }
 0x150   : > { %1069 = vmatprep.subr.mxu1 %v1394_v0 }
 0x151   : > { %1070 = vmatpush3.msra.mxu1 %v688_v49 }
 0x152   : > { %1071 = vmatprep.subr.mxu1 %v1394_v0 }
 0x153   : > { %1072 = vmatpush3.msra.mxu1 %v687_v50 }
 0x154   : > { %1073 = vmatprep.subr.mxu1 %v1394_v0 }
 0x155   : > { %1074 = vmatpush3.msra.mxu1 %v686_v51 }
 0x156   : > { %1075 = vmatprep.subr.mxu1 %v1394_v0 }
 0x157   : > { %1076 = vmatpush3.msra.mxu1 %v685_v52 }
 0x158   : > { %1077 = vmatprep.subr.mxu1 %v1394_v0 }
 0x159   : > { %1078 = vmatpush3.msra.mxu1 %v684_v53 }
 0x15a   : > { %1079 = vmatprep.subr.mxu1 %v1394_v0 }
 0x15b   : > { %1080 = vmatpush3.msra.mxu1 %v683_v54 }
 0x15c   : > { %1081 = vmatprep.subr.mxu1 %v1394_v0 }
 0x15d   : > { %1082 = vmatpush3.msra.mxu1 %v682_v60 }
 0x15e   : > { %1083 = vmatprep.subr.mxu1 %v1394_v0 }
 0x15f   : > { %1084 = vmatpush3.msra.mxu1 %v681_v61 }
 0x160   : > { %1085 = vmatprep.subr.mxu1 %v1394_v0 }
 0x161   : > { %1086 = vmatpush3.msra.mxu1 %v680_v62 }
 0x202   : > { %v581_v56 = vpop.f32.mrf.mxu1 }
 0x203   : > { %v582_v57 = vadd.f32 %v914_v55, %v581_v56 }
 0x204   : > { %v1019_v58 = vpop.f32.mrf.mxu1 }
 0x205   : > { %v585_v59 = vmax.f32 %v582_v57, 0.0 }
 0x207   : > { %1053 = vmatmul.mubr.f32.vlgmr.msra.gmra.mxu0 %v585_v59 }
 0x2c7   : > { %v675_v1 = vpop.f32.mrf.mxu0 }
 0x2c8   : > { %v676_v2 = vadd.f32 %v915_v63, %v675_v1 }
 0x2c9   : > { %v1054_v3 = vpop.f32.mrf.mxu0 }
 0x2ca   : > { %v679_v4 = vmax.f32 %v676_v2, 0.0 }
 0x2cc   : > { %1088 = vmatmul.mubr.f32.vlgmr.msra.gmra.mxu1 %v679_v4 }
 0x38c   : > { %v769_v0 = vpop.f32.mrf.mxu1 }
 0x38d   : > { %v770_v6 = vadd.f32 %v916_v5, %v769_v0 }
 0x38e   : > { %v1089_v7 = vpop.f32.mrf.mxu1 }
 0x38f   : > { %773 = vst [vmem:[%s405_s19] sm:$0xff] %v770_v6 }
 0x390   : > { %1326 = shalt.err (!%p1323_p11)
}
 0x391   : > { %s1327_s25 = scalar_lea.hbm %s1706_s7, 128  ;;  %s1331_s28 = scalar_lea.hbm %s1752_s9, 256 }
 0x392   : > { %p1328_p13 = scmp.ne.s32.totalorder %s1706_s7, %s1327_s25  ;;  %p1332_p4 = scmp.lt.s32.totalorder %s1706_s7, %s1752_s9 }
 0x393   : > { %p1333_p6 = scmp.lt.s32.totalorder %s1331_s28, %s1327_s25 }
 0x394   : > { %p1329_p1 = pnand %p1328_p13, %p1778_p7 }
 0x395   : > { %p1334_p5 = por %p1333_p6, %p1332_p4 }
 0x396   : > { %p1330_p3 = pneg %p1329_p1 }
 0x398   : > { %p1335_p8 = pnand %p1334_p5, %p1330_p3 }
 0x39a   : > { %1338 = shalt.err (!%p1335_p8)
}
 0x39b   : > { %1108 = dma.vmem_to_hbm [thread:$0]  (%p1778_p7), %s789_s13, 128, %s1706_s7, %s775_s1  }
 0x39c PF: > { %s800_s18 = sand.u32 1, %s1373_s30   ;;  %p1779_p10 = scmp.ne.s32.totalorder %s1770_s17, 0 }
 0x39d   : > { %p1780_p0 = scmp.ge.s32.totalorder %s1385_s12, 2  ;;  %s801_s19 = scalar_lea.sflag [#allocation4], %s800_s18 }
 0x39f   : > { %p1128_p12 = pnand %p1780_p0, %p1779_p10 }
 0x3a1   : > { %p1129_p2 = pneg %p1128_p12 }
 0x3a3   : > { %1368 = dma.done.wait (%p1129_p2), %s801_s19, 128  }
 0x3a4   : > { %1370 = vsyncadd (%p1129_p2), %s801_s19, 4294967168  ;;  %p24_p9 = scmp.ge.s32.totalorder %s1548_s26, 4   ;;  %s1781_s30 = smov %s1377_s10 }
 0x3a5   : > { %s1782_s10 = smov %s1381_s11  ;;  %s1783_s11 = smov %s1559_s29 }
 0x3a6   : > { %s1784_s12 = smov %s1548_s26  ;;  %26 = sbr.rel (!%p24_p9) target bundleno = 12 (0xc), region = 117 }
 0x3ab   :  { %806 = vsyncpa [#allocation3], 1 }
 0x3ac   :  { %808 = vsyncpa [#allocation3 + $0x1], 1 }
 0x3ad   :  { %809 = vsyncpa [#allocation6], 1 }
 0x3ae   :  { %810 = vsyncpa [#allocation9], 1 }
 0x3af   :  { %811 = vsyncpa [#allocation4], 1 }
 0x3b0   :  { %813 = vsyncpa [#allocation4 + $0x1], 1 }

</bundles_post_ra>
